<compile_context>
chip_gen: v5e
topology: v5e:2x2
jax: 0.10.0
libtpu: 0.0.40
codegen_flags: <defaults>
</compile_context>

<pallas_src>
import numpy as np

import jax
import jax.numpy as jnp
from jax.experimental import pallas as pl
from jax.experimental.pallas import tpu as pltpu


_IN_C, _IN_H, _IN_W = 3, 32, 32
_NUM_CLASSES = 8

_CONV_CFG = (
    # (w_key,     b_key,     c_in, c_out, k, spatial_in)
    ("conv1_w", "conv1_b", 3, 6, 5, 32),    # -> 28x28x6,  pool -> 14x14x6
    ("conv2_w", "conv2_b", 6, 16, 5, 14),   # -> 10x10x16, pool -> 5x5x16
    ("conv3_w", "conv3_b", 16, 32, 3, 5),   # -> 3x3x32,   pool(floor) -> 1x1x32
)


# ----------------------------- fused Pallas kernel ---------------------------

def _lenet_fused_kernel(x_ref,
                        m1_ref, bc1_ref, ph1_ref, pw1_ref,
                        m2_ref, bc2_ref, ph2_ref, pw2_ref,
                        m3_ref, bc3_ref, ph3_ref, pw3_ref,
                        fw1_ref, fb1_ref, fw2_ref, fb2_ref, fw3_ref, fb3_ref,
                        o_ref):
    """One batch element per grid step: full conv/pool stack + FC tail + softmax."""
    f32 = jnp.float32

    def conv_relu(h, m_ref, bc_ref, kh, h_out):
        # h: (Hin, Win*Cin); m_ref: (KH, Win*Cin, Wout*Cout); bc: (1, Wout*Cout)
        acc = jnp.dot(h[0:h_out, :], m_ref[0], preferred_element_type=f32)
        for ki in range(1, kh):
            acc = acc + jnp.dot(h[ki:ki + h_out, :], m_ref[ki],
                                preferred_element_type=f32)
        return jnp.maximum(acc + bc_ref[...], 0.0)

    def avgpool2x2(h, ph_ref, pw_ref):
        # (Hout, W*C) -> (Hout//2, (W//2)*C); both halves are lane-dense matmuls.
        h = jnp.dot(ph_ref[...], h, preferred_element_type=f32)
        return jnp.dot(h, pw_ref[...], preferred_element_type=f32)

    h = x_ref[0]                                    # (32, 32*3)
    h = conv_relu(h, m1_ref, bc1_ref, 5, 28)        # (28, 28*6)
    h = avgpool2x2(h, ph1_ref, pw1_ref)             # (14, 14*6)
    h = conv_relu(h, m2_ref, bc2_ref, 5, 10)        # (10, 10*16)
    h = avgpool2x2(h, ph2_ref, pw2_ref)             # (5,  5*16)
    h = conv_relu(h, m3_ref, bc3_ref, 3, 3)         # (3,  3*32)
    h = avgpool2x2(h, ph3_ref, pw3_ref)             # (1, 32)  floor-mode 2x2 pool

    h = jnp.maximum(jnp.dot(h, fw1_ref[...], preferred_element_type=f32)
                    + fb1_ref[...], 0.0)            # (1, 120)
    h = jnp.maximum(jnp.dot(h, fw2_ref[...], preferred_element_type=f32)
                    + fb2_ref[...], 0.0)            # (1, 84)
    logits = (jnp.dot(h, fw3_ref[...], preferred_element_type=f32)
              + fb3_ref[...])                       # (1, 8)

    # softmax over the class lanes; reciprocal on the EUP slot.
    m = jnp.max(logits, axis=-1, keepdims=True)
    e = jnp.exp(logits - m)
    s = jnp.sum(e, axis=-1, keepdims=True)
    o_ref[0] = (e * pl.reciprocal(s, approx=True)).astype(o_ref.dtype)


# --------------------------- weight / constant packing -----------------------

def _shift_matrix(k, w_in, w_out):
    """S[kj, wi, wo] = 1 iff wi == wo + kj (valid-conv window membership)."""
    s = np.zeros((k, w_in, w_out), np.float32)
    for kj in range(k):
        for wo in range(w_out):
            s[kj, wo + kj, wo] = 1.0
    return s


def _pool_h_matrix(h_in):
    """(Hout, Hin) left matmul operand: averages H row pairs (floor mode)."""
    h_out = h_in // 2
    m = np.zeros((h_out, h_in), np.float32)
    for a in range(h_out):
        m[a, 2 * a] = 0.5
        m[a, 2 * a + 1] = 0.5
    return m


def _pool_w_matrix(w_in, c):
    """(Win*C, Wout*C) right matmul operand: averages W pairs per channel."""
    w_out = w_in // 2
    m = np.zeros((w_in * c, w_out * c), np.float32)
    for b in range(w_out):
        for db in (0, 1):
            for ch in range(c):
                m[(2 * b + db) * c + ch, b * c + ch] = 0.5
    return m


def pack_params(params):
    """One-time prepacking of PyTorch-layout params into kernel operands.

    Conv weights (Cout, Cin, K, K) become, for each kernel-row offset ki, a
    banded matrix M[ki] with M[ki, wi*Cin+ci, wo*Cout+co] = w[co, ci, ki, wi-wo],
    so conv == sum_ki  x[ki:ki+Hout, :] @ M[ki]  in the (H, W*C) layout.
    """
    hi = jax.lax.Precision.HIGHEST
    ops = []
    for (wk, bk, c_in, c_out, k, s_in) in _CONV_CFG:
        w = params[wk]                                   # (Cout, Cin, K, K)
        b = params[bk]                                   # (Cout,)
        s_out = s_in - k + 1
        shift = jnp.asarray(_shift_matrix(k, s_in, s_out))
        m = jnp.einsum("oihj,jab->haibo", w, shift, precision=hi)
        m = m.reshape(k, s_in * c_in, s_out * c_out)     # (K, Win*Cin, Wout*Cout)
        bc = jnp.tile(b, (s_out,)).reshape(1, s_out * c_out)
        ph = jnp.asarray(_pool_h_matrix(s_out))
        pw = jnp.asarray(_pool_w_matrix(s_out, c_out))
        ops += [m, bc, ph, pw]
    ops += [
        params["fc1_w"].T, params["fc1_b"].reshape(1, -1),
        params["fc2_w"].T, params["fc2_b"].reshape(1, -1),
        params["fc3_w"].T, params["fc3_b"].reshape(1, -1),
    ]
    return tuple(ops)


# ---------------------------------- forward ----------------------------------

def lenet_forward(packed, x):
    """x: (N, 3, 32, 32) NCHW float32 -> (N, 8) softmax probabilities."""
    n, c, h, w = x.shape
    assert (c, h, w) == (_IN_C, _IN_H, _IN_W)
    # Single layout change at the boundary: NCHW -> (N, H, W*C) channels-last.
    xk = jnp.transpose(x, (0, 2, 3, 1)).reshape(n, h, w * c)

    def _const_spec(shape):
        nd = len(shape)
        return pl.BlockSpec(shape, lambda i: (0,) * nd)

    in_specs = [pl.BlockSpec((1, h, w * c), lambda i: (i, 0, 0))]
    in_specs += [_const_spec(p.shape) for p in packed]

    out = pl.pallas_call(
        _lenet_fused_kernel,
        out_shape=jax.ShapeDtypeStruct((n, 1, _NUM_CLASSES), jnp.float32),
        grid=(n,),
        in_specs=in_specs,
        out_specs=pl.BlockSpec((1, 1, _NUM_CLASSES), lambda i: (i, 0, 0)),
        compiler_params=pltpu.CompilerParams(
            dimension_semantics=("parallel",)),
    )(xk, *packed)
    return out.reshape(n, _NUM_CLASSES)


# ------------------------------- parameters ----------------------------------

def init_params(key):
    def u(k, shape, fan_in):
        bound = 1.0 / jnp.sqrt(jnp.float32(fan_in))
        return jax.random.uniform(k, shape, jnp.float32, -bound, bound)

    ks = jax.random.split(key, 12)
    return {
        "conv1_w": u(ks[0], (6, 3, 5, 5), 3 * 5 * 5),
        "conv1_b": u(ks[1], (6,), 3 * 5 * 5),
        "conv2_w": u(ks[2], (16, 6, 5, 5), 6 * 5 * 5),
        "conv2_b": u(ks[3], (16,), 6 * 5 * 5),
        "conv3_w": u(ks[4], (32, 16, 3, 3), 16 * 3 * 3),
        "conv3_b": u(ks[5], (32,), 16 * 3 * 3),
        "fc1_w": u(ks[6], (120, 32), 32),     # PyTorch Linear layout: (out, in)
        "fc1_b": u(ks[7], (120,), 32),
        "fc2_w": u(ks[8], (84, 120), 120),
        "fc2_b": u(ks[9], (84,), 120),
        "fc3_w": u(ks[10], (8, 84), 84),
        "fc3_b": u(ks[11], (8,), 84),
    }


# --------------------------- pure-JAX reference -------------------------------

def ref_forward(params, x):
    """Plain-JAX reference mirroring the PyTorch module (for validation)."""
    hi = jax.lax.Precision.HIGHEST

    def conv_relu(x, w, b):
        y = jax.lax.conv_general_dilated(
            x, w, window_strides=(1, 1), padding="VALID",
            dimension_numbers=("NCHW", "OIHW", "NCHW"), precision=hi)
        return jax.nn.relu(y + b[None, :, None, None])

    def avgpool2x2(x):
        n, c, h, w = x.shape
        ho, wo = h // 2, w // 2
        x = x[:, :, :ho * 2, :wo * 2]
        return x.reshape(n, c, ho, 2, wo, 2).mean(axis=(3, 5))

    x = avgpool2x2(conv_relu(x, params["conv1_w"], params["conv1_b"]))
    x = avgpool2x2(conv_relu(x, params["conv2_w"], params["conv2_b"]))
    x = avgpool2x2(conv_relu(x, params["conv3_w"], params["conv3_b"]))
    x = x.reshape(x.shape[0], -1)
    x = jax.nn.relu(jnp.dot(x, params["fc1_w"].T, precision=hi) + params["fc1_b"])
    x = jax.nn.relu(jnp.dot(x, params["fc2_w"].T, precision=hi) + params["fc2_b"])
    x = jnp.dot(x, params["fc3_w"].T, precision=hi) + params["fc3_b"]
    return jax.nn.softmax(x, axis=1)


# ------------------------------------ main ------------------------------------

if __name__ == "__main__":
    key = jax.random.PRNGKey(0)
    pkey, xkey = jax.random.split(key)
    params = init_params(pkey)

    # Smallest input the architecture implies: 3x32x32 reaches 32x1x1 before fc1.
    x = jax.random.normal(xkey, (2, 3, 32, 32), jnp.float32)

    packed = pack_params(params)               # one-time weight prepacking
    fwd = jax.jit(lenet_forward)
    out = jax.block_until_ready(fwd(packed, x))

    ref = jax.block_until_ready(ref_forward(params, x))

    assert out.shape == (2, _NUM_CLASSES), out.shape
    assert bool(jnp.all(jnp.isfinite(out)))
    # approx reciprocal in the softmax epilogue => allow small normalization slack
    assert bool(jnp.allclose(jnp.sum(out, axis=1), 1.0, atol=1e-2))
    # tolerance covers approx-reciprocal + MXU pass-ordering differences; any real
    # layout/packing bug would produce O(0.1) probability errors.
    assert bool(jnp.allclose(out, ref, atol=2e-2)), float(jnp.max(jnp.abs(out - ref)))
    print("KERNEL_OK")
</pallas_src>

<mosaic_0001>
module attributes {stable_mosaic.version = 11 : i64} {
  func.func @_lenet_fused_kernel(%arg0: i32, %arg1: memref<1x32x96xf32, #tpu.memory_space<vmem>>, %arg2: memref<5x96x168xf32, #tpu.memory_space<vmem>>, %arg3: memref<1x168xf32, #tpu.memory_space<vmem>>, %arg4: memref<14x28xf32, #tpu.memory_space<vmem>>, %arg5: memref<168x84xf32, #tpu.memory_space<vmem>>, %arg6: memref<5x84x160xf32, #tpu.memory_space<vmem>>, %arg7: memref<1x160xf32, #tpu.memory_space<vmem>>, %arg8: memref<5x10xf32, #tpu.memory_space<vmem>>, %arg9: memref<160x80xf32, #tpu.memory_space<vmem>>, %arg10: memref<3x80x96xf32, #tpu.memory_space<vmem>>, %arg11: memref<1x96xf32, #tpu.memory_space<vmem>>, %arg12: memref<1x3xf32, #tpu.memory_space<vmem>>, %arg13: memref<96x32xf32, #tpu.memory_space<vmem>>, %arg14: memref<32x120xf32, #tpu.memory_space<vmem>>, %arg15: memref<1x120xf32, #tpu.memory_space<vmem>>, %arg16: memref<120x84xf32, #tpu.memory_space<vmem>>, %arg17: memref<1x84xf32, #tpu.memory_space<vmem>>, %arg18: memref<84x8xf32, #tpu.memory_space<vmem>>, %arg19: memref<1x8xf32, #tpu.memory_space<vmem>>, %arg20: memref<1x1x8xf32, #tpu.memory_space<vmem>>) attributes {dimension_semantics = [#tpu.dimension_semantics<parallel>], iteration_bounds = array<i64: 2>, scalar_prefetch = 0 : i64, scratch_operands = 0 : i64, tpu.core_type = #tpu.core_type<tc>, window_params = [{transform_indices = @transform_0, window_bounds = array<i64: 1, 32, 96>}, {pipeline_mode = #tpu.pipeline_mode<synchronous>, transform_indices = @transform_1, window_bounds = array<i64: 5, 96, 168>}, {pipeline_mode = #tpu.pipeline_mode<synchronous>, transform_indices = @transform_2, window_bounds = array<i64: 1, 168>}, {pipeline_mode = #tpu.pipeline_mode<synchronous>, transform_indices = @transform_3, window_bounds = array<i64: 14, 28>}, {pipeline_mode = #tpu.pipeline_mode<synchronous>, transform_indices = @transform_4, window_bounds = array<i64: 168, 84>}, {pipeline_mode = #tpu.pipeline_mode<synchronous>, transform_indices = @transform_5, window_bounds = array<i64: 5, 84, 160>}, {pipeline_mode = #tpu.pipeline_mode<synchronous>, transform_indices = @transform_6, window_bounds = array<i64: 1, 160>}, {pipeline_mode = #tpu.pipeline_mode<synchronous>, transform_indices = @transform_7, window_bounds = array<i64: 5, 10>}, {pipeline_mode = #tpu.pipeline_mode<synchronous>, transform_indices = @transform_8, window_bounds = array<i64: 160, 80>}, {pipeline_mode = #tpu.pipeline_mode<synchronous>, transform_indices = @transform_9, window_bounds = array<i64: 3, 80, 96>}, {pipeline_mode = #tpu.pipeline_mode<synchronous>, transform_indices = @transform_10, window_bounds = array<i64: 1, 96>}, {pipeline_mode = #tpu.pipeline_mode<synchronous>, transform_indices = @transform_11, window_bounds = array<i64: 1, 3>}, {pipeline_mode = #tpu.pipeline_mode<synchronous>, transform_indices = @transform_12, window_bounds = array<i64: 96, 32>}, {pipeline_mode = #tpu.pipeline_mode<synchronous>, transform_indices = @transform_13, window_bounds = array<i64: 32, 120>}, {pipeline_mode = #tpu.pipeline_mode<synchronous>, transform_indices = @transform_14, window_bounds = array<i64: 1, 120>}, {pipeline_mode = #tpu.pipeline_mode<synchronous>, transform_indices = @transform_15, window_bounds = array<i64: 120, 84>}, {pipeline_mode = #tpu.pipeline_mode<synchronous>, transform_indices = @transform_16, window_bounds = array<i64: 1, 84>}, {pipeline_mode = #tpu.pipeline_mode<synchronous>, transform_indices = @transform_17, window_bounds = array<i64: 84, 8>}, {pipeline_mode = #tpu.pipeline_mode<synchronous>, transform_indices = @transform_18, window_bounds = array<i64: 1, 8>}, {transform_indices = @transform_19, window_bounds = array<i64: 1, 1, 8>}]} {
    %c0 = arith.constant 0 : index
    %c0_0 = arith.constant 0 : index
    %c0_1 = arith.constant 0 : index
    %0 = vector.load %arg1[%c0, %c0_0, %c0_1] : memref<1x32x96xf32, #tpu.memory_space<vmem>>, vector<1x32x96xf32>
    %1 = vector.shape_cast %0 : vector<1x32x96xf32> to vector<32x96xf32>
    %2 = vector.extract_strided_slice %1 {offsets = [0, 0], sizes = [28, 96], strides = [1, 1]} : vector<32x96xf32> to vector<28x96xf32>
    %c0_2 = arith.constant 0 : index
    %c0_3 = arith.constant 0 : index
    %c0_4 = arith.constant 0 : index
    %3 = vector.load %arg2[%c0_2, %c0_3, %c0_4] : memref<5x96x168xf32, #tpu.memory_space<vmem>>, vector<1x96x168xf32>
    %4 = vector.shape_cast %3 : vector<1x96x168xf32> to vector<96x168xf32>
    %cst = arith.constant dense<0.000000e+00> : vector<28x168xf32>
    %5 = tpu.matmul %2, %4, %cst {dimension_numbers = #tpu.dot_dimension_numbers<[1], [0], [0], [1], [0, 0, 1, 1], [], []>} : vector<28x96xf32>, vector<96x168xf32>, vector<28x168xf32> -> vector<28x168xf32>
    %6 = vector.extract_strided_slice %1 {offsets = [1, 0], sizes = [28, 96], strides = [1, 1]} : vector<32x96xf32> to vector<28x96xf32>
    %c1 = arith.constant 1 : index
    %c0_5 = arith.constant 0 : index
    %c0_6 = arith.constant 0 : index
    %7 = vector.load %arg2[%c1, %c0_5, %c0_6] : memref<5x96x168xf32, #tpu.memory_space<vmem>>, vector<1x96x168xf32>
    %8 = vector.shape_cast %7 : vector<1x96x168xf32> to vector<96x168xf32>
    %cst_7 = arith.constant dense<0.000000e+00> : vector<28x168xf32>
    %9 = tpu.matmul %6, %8, %cst_7 {dimension_numbers = #tpu.dot_dimension_numbers<[1], [0], [0], [1], [0, 0, 1, 1], [], []>} : vector<28x96xf32>, vector<96x168xf32>, vector<28x168xf32> -> vector<28x168xf32>
    %10 = arith.addf %5, %9 : vector<28x168xf32>
    %11 = vector.extract_strided_slice %1 {offsets = [2, 0], sizes = [28, 96], strides = [1, 1]} : vector<32x96xf32> to vector<28x96xf32>
    %c2 = arith.constant 2 : index
    %c0_8 = arith.constant 0 : index
    %c0_9 = arith.constant 0 : index
    %12 = vector.load %arg2[%c2, %c0_8, %c0_9] : memref<5x96x168xf32, #tpu.memory_space<vmem>>, vector<1x96x168xf32>
    %13 = vector.shape_cast %12 : vector<1x96x168xf32> to vector<96x168xf32>
    %cst_10 = arith.constant dense<0.000000e+00> : vector<28x168xf32>
    %14 = tpu.matmul %11, %13, %cst_10 {dimension_numbers = #tpu.dot_dimension_numbers<[1], [0], [0], [1], [0, 0, 1, 1], [], []>} : vector<28x96xf32>, vector<96x168xf32>, vector<28x168xf32> -> vector<28x168xf32>
    %15 = arith.addf %10, %14 : vector<28x168xf32>
    %16 = vector.extract_strided_slice %1 {offsets = [3, 0], sizes = [28, 96], strides = [1, 1]} : vector<32x96xf32> to vector<28x96xf32>
    %c3 = arith.constant 3 : index
    %c0_11 = arith.constant 0 : index
    %c0_12 = arith.constant 0 : index
    %17 = vector.load %arg2[%c3, %c0_11, %c0_12] : memref<5x96x168xf32, #tpu.memory_space<vmem>>, vector<1x96x168xf32>
    %18 = vector.shape_cast %17 : vector<1x96x168xf32> to vector<96x168xf32>
    %cst_13 = arith.constant dense<0.000000e+00> : vector<28x168xf32>
    %19 = tpu.matmul %16, %18, %cst_13 {dimension_numbers = #tpu.dot_dimension_numbers<[1], [0], [0], [1], [0, 0, 1, 1], [], []>} : vector<28x96xf32>, vector<96x168xf32>, vector<28x168xf32> -> vector<28x168xf32>
    %20 = arith.addf %15, %19 : vector<28x168xf32>
    %21 = vector.extract_strided_slice %1 {offsets = [4, 0], sizes = [28, 96], strides = [1, 1]} : vector<32x96xf32> to vector<28x96xf32>
    %c4 = arith.constant 4 : index
    %c0_14 = arith.constant 0 : index
    %c0_15 = arith.constant 0 : index
    %22 = vector.load %arg2[%c4, %c0_14, %c0_15] : memref<5x96x168xf32, #tpu.memory_space<vmem>>, vector<1x96x168xf32>
    %23 = vector.shape_cast %22 : vector<1x96x168xf32> to vector<96x168xf32>
    %cst_16 = arith.constant dense<0.000000e+00> : vector<28x168xf32>
    %24 = tpu.matmul %21, %23, %cst_16 {dimension_numbers = #tpu.dot_dimension_numbers<[1], [0], [0], [1], [0, 0, 1, 1], [], []>} : vector<28x96xf32>, vector<96x168xf32>, vector<28x168xf32> -> vector<28x168xf32>
    %25 = arith.addf %20, %24 : vector<28x168xf32>
    %c0_17 = arith.constant 0 : index
    %c0_18 = arith.constant 0 : index
    %26 = vector.load %arg3[%c0_17, %c0_18] : memref<1x168xf32, #tpu.memory_space<vmem>>, vector<1x168xf32>
    %27 = vector.broadcast %26 : vector<1x168xf32> to vector<28x168xf32>
    %28 = arith.addf %25, %27 : vector<28x168xf32>
    %cst_19 = arith.constant 0.000000e+00 : f32
    %29 = vector.broadcast %cst_19 : f32 to vector<28x168xf32>
    %30 = arith.maximumf %28, %29 : vector<28x168xf32>
    %c0_20 = arith.constant 0 : index
    %c0_21 = arith.constant 0 : index
    %31 = vector.load %arg4[%c0_20, %c0_21] : memref<14x28xf32, #tpu.memory_space<vmem>>, vector<14x28xf32>
    %cst_22 = arith.constant dense<0.000000e+00> : vector<14x168xf32>
    %32 = tpu.matmul %31, %30, %cst_22 {dimension_numbers = #tpu.dot_dimension_numbers<[1], [0], [0], [1], [0, 0, 1, 1], [], []>} : vector<14x28xf32>, vector<28x168xf32>, vector<14x168xf32> -> vector<14x168xf32>
    %c0_23 = arith.constant 0 : index
    %c0_24 = arith.constant 0 : index
    %33 = vector.load %arg5[%c0_23, %c0_24] : memref<168x84xf32, #tpu.memory_space<vmem>>, vector<168x84xf32>
    %cst_25 = arith.constant dense<0.000000e+00> : vector<14x84xf32>
    %34 = tpu.matmul %32, %33, %cst_25 {dimension_numbers = #tpu.dot_dimension_numbers<[1], [0], [0], [1], [0, 0, 1, 1], [], []>} : vector<14x168xf32>, vector<168x84xf32>, vector<14x84xf32> -> vector<14x84xf32>
    %35 = vector.extract_strided_slice %34 {offsets = [0, 0], sizes = [10, 84], strides = [1, 1]} : vector<14x84xf32> to vector<10x84xf32>
    %c0_26 = arith.constant 0 : index
    %c0_27 = arith.constant 0 : index
    %c0_28 = arith.constant 0 : index
    %36 = vector.load %arg6[%c0_26, %c0_27, %c0_28] : memref<5x84x160xf32, #tpu.memory_space<vmem>>, vector<1x84x160xf32>
    %37 = vector.shape_cast %36 : vector<1x84x160xf32> to vector<84x160xf32>
    %cst_29 = arith.constant dense<0.000000e+00> : vector<10x160xf32>
    %38 = tpu.matmul %35, %37, %cst_29 {dimension_numbers = #tpu.dot_dimension_numbers<[1], [0], [0], [1], [0, 0, 1, 1], [], []>} : vector<10x84xf32>, vector<84x160xf32>, vector<10x160xf32> -> vector<10x160xf32>
    %39 = vector.extract_strided_slice %34 {offsets = [1, 0], sizes = [10, 84], strides = [1, 1]} : vector<14x84xf32> to vector<10x84xf32>
    %c1_30 = arith.constant 1 : index
    %c0_31 = arith.constant 0 : index
    %c0_32 = arith.constant 0 : index
    %40 = vector.load %arg6[%c1_30, %c0_31, %c0_32] : memref<5x84x160xf32, #tpu.memory_space<vmem>>, vector<1x84x160xf32>
    %41 = vector.shape_cast %40 : vector<1x84x160xf32> to vector<84x160xf32>
    %cst_33 = arith.constant dense<0.000000e+00> : vector<10x160xf32>
    %42 = tpu.matmul %39, %41, %cst_33 {dimension_numbers = #tpu.dot_dimension_numbers<[1], [0], [0], [1], [0, 0, 1, 1], [], []>} : vector<10x84xf32>, vector<84x160xf32>, vector<10x160xf32> -> vector<10x160xf32>
    %43 = arith.addf %38, %42 : vector<10x160xf32>
    %44 = vector.extract_strided_slice %34 {offsets = [2, 0], sizes = [10, 84], strides = [1, 1]} : vector<14x84xf32> to vector<10x84xf32>
    %c2_34 = arith.constant 2 : index
    %c0_35 = arith.constant 0 : index
    %c0_36 = arith.constant 0 : index
    %45 = vector.load %arg6[%c2_34, %c0_35, %c0_36] : memref<5x84x160xf32, #tpu.memory_space<vmem>>, vector<1x84x160xf32>
    %46 = vector.shape_cast %45 : vector<1x84x160xf32> to vector<84x160xf32>
    %cst_37 = arith.constant dense<0.000000e+00> : vector<10x160xf32>
    %47 = tpu.matmul %44, %46, %cst_37 {dimension_numbers = #tpu.dot_dimension_numbers<[1], [0], [0], [1], [0, 0, 1, 1], [], []>} : vector<10x84xf32>, vector<84x160xf32>, vector<10x160xf32> -> vector<10x160xf32>
    %48 = arith.addf %43, %47 : vector<10x160xf32>
    %49 = vector.extract_strided_slice %34 {offsets = [3, 0], sizes = [10, 84], strides = [1, 1]} : vector<14x84xf32> to vector<10x84xf32>
    %c3_38 = arith.constant 3 : index
    %c0_39 = arith.constant 0 : index
    %c0_40 = arith.constant 0 : index
    %50 = vector.load %arg6[%c3_38, %c0_39, %c0_40] : memref<5x84x160xf32, #tpu.memory_space<vmem>>, vector<1x84x160xf32>
    %51 = vector.shape_cast %50 : vector<1x84x160xf32> to vector<84x160xf32>
    %cst_41 = arith.constant dense<0.000000e+00> : vector<10x160xf32>
    %52 = tpu.matmul %49, %51, %cst_41 {dimension_numbers = #tpu.dot_dimension_numbers<[1], [0], [0], [1], [0, 0, 1, 1], [], []>} : vector<10x84xf32>, vector<84x160xf32>, vector<10x160xf32> -> vector<10x160xf32>
    %53 = arith.addf %48, %52 : vector<10x160xf32>
    %54 = vector.extract_strided_slice %34 {offsets = [4, 0], sizes = [10, 84], strides = [1, 1]} : vector<14x84xf32> to vector<10x84xf32>
    %c4_42 = arith.constant 4 : index
    %c0_43 = arith.constant 0 : index
    %c0_44 = arith.constant 0 : index
    %55 = vector.load %arg6[%c4_42, %c0_43, %c0_44] : memref<5x84x160xf32, #tpu.memory_space<vmem>>, vector<1x84x160xf32>
    %56 = vector.shape_cast %55 : vector<1x84x160xf32> to vector<84x160xf32>
    %cst_45 = arith.constant dense<0.000000e+00> : vector<10x160xf32>
    %57 = tpu.matmul %54, %56, %cst_45 {dimension_numbers = #tpu.dot_dimension_numbers<[1], [0], [0], [1], [0, 0, 1, 1], [], []>} : vector<10x84xf32>, vector<84x160xf32>, vector<10x160xf32> -> vector<10x160xf32>
    %58 = arith.addf %53, %57 : vector<10x160xf32>
    %c0_46 = arith.constant 0 : index
    %c0_47 = arith.constant 0 : index
    %59 = vector.load %arg7[%c0_46, %c0_47] : memref<1x160xf32, #tpu.memory_space<vmem>>, vector<1x160xf32>
    %60 = vector.broadcast %59 : vector<1x160xf32> to vector<10x160xf32>
    %61 = arith.addf %58, %60 : vector<10x160xf32>
    %cst_48 = arith.constant 0.000000e+00 : f32
    %62 = vector.broadcast %cst_48 : f32 to vector<10x160xf32>
    %63 = arith.maximumf %61, %62 : vector<10x160xf32>
    %c0_49 = arith.constant 0 : index
    %c0_50 = arith.constant 0 : index
    %64 = vector.load %arg8[%c0_49, %c0_50] : memref<5x10xf32, #tpu.memory_space<vmem>>, vector<5x10xf32>
    %cst_51 = arith.constant dense<0.000000e+00> : vector<5x160xf32>
    %65 = tpu.matmul %64, %63, %cst_51 {dimension_numbers = #tpu.dot_dimension_numbers<[1], [0], [0], [1], [0, 0, 1, 1], [], []>} : vector<5x10xf32>, vector<10x160xf32>, vector<5x160xf32> -> vector<5x160xf32>
    %c0_52 = arith.constant 0 : index
    %c0_53 = arith.constant 0 : index
    %66 = vector.load %arg9[%c0_52, %c0_53] : memref<160x80xf32, #tpu.memory_space<vmem>>, vector<160x80xf32>
    %cst_54 = arith.constant dense<0.000000e+00> : vector<5x80xf32>
    %67 = tpu.matmul %65, %66, %cst_54 {dimension_numbers = #tpu.dot_dimension_numbers<[1], [0], [0], [1], [0, 0, 1, 1], [], []>} : vector<5x160xf32>, vector<160x80xf32>, vector<5x80xf32> -> vector<5x80xf32>
    %68 = vector.extract_strided_slice %67 {offsets = [0, 0], sizes = [3, 80], strides = [1, 1]} : vector<5x80xf32> to vector<3x80xf32>
    %c0_55 = arith.constant 0 : index
    %c0_56 = arith.constant 0 : index
    %c0_57 = arith.constant 0 : index
    %69 = vector.load %arg10[%c0_55, %c0_56, %c0_57] : memref<3x80x96xf32, #tpu.memory_space<vmem>>, vector<1x80x96xf32>
    %70 = vector.shape_cast %69 : vector<1x80x96xf32> to vector<80x96xf32>
    %cst_58 = arith.constant dense<0.000000e+00> : vector<3x96xf32>
    %71 = tpu.matmul %68, %70, %cst_58 {dimension_numbers = #tpu.dot_dimension_numbers<[1], [0], [0], [1], [0, 0, 1, 1], [], []>} : vector<3x80xf32>, vector<80x96xf32>, vector<3x96xf32> -> vector<3x96xf32>
    %72 = vector.extract_strided_slice %67 {offsets = [1, 0], sizes = [3, 80], strides = [1, 1]} : vector<5x80xf32> to vector<3x80xf32>
    %c1_59 = arith.constant 1 : index
    %c0_60 = arith.constant 0 : index
    %c0_61 = arith.constant 0 : index
    %73 = vector.load %arg10[%c1_59, %c0_60, %c0_61] : memref<3x80x96xf32, #tpu.memory_space<vmem>>, vector<1x80x96xf32>
    %74 = vector.shape_cast %73 : vector<1x80x96xf32> to vector<80x96xf32>
    %cst_62 = arith.constant dense<0.000000e+00> : vector<3x96xf32>
    %75 = tpu.matmul %72, %74, %cst_62 {dimension_numbers = #tpu.dot_dimension_numbers<[1], [0], [0], [1], [0, 0, 1, 1], [], []>} : vector<3x80xf32>, vector<80x96xf32>, vector<3x96xf32> -> vector<3x96xf32>
    %76 = arith.addf %71, %75 : vector<3x96xf32>
    %77 = vector.extract_strided_slice %67 {offsets = [2, 0], sizes = [3, 80], strides = [1, 1]} : vector<5x80xf32> to vector<3x80xf32>
    %c2_63 = arith.constant 2 : index
    %c0_64 = arith.constant 0 : index
    %c0_65 = arith.constant 0 : index
    %78 = vector.load %arg10[%c2_63, %c0_64, %c0_65] : memref<3x80x96xf32, #tpu.memory_space<vmem>>, vector<1x80x96xf32>
    %79 = vector.shape_cast %78 : vector<1x80x96xf32> to vector<80x96xf32>
    %cst_66 = arith.constant dense<0.000000e+00> : vector<3x96xf32>
    %80 = tpu.matmul %77, %79, %cst_66 {dimension_numbers = #tpu.dot_dimension_numbers<[1], [0], [0], [1], [0, 0, 1, 1], [], []>} : vector<3x80xf32>, vector<80x96xf32>, vector<3x96xf32> -> vector<3x96xf32>
    %81 = arith.addf %76, %80 : vector<3x96xf32>
    %c0_67 = arith.constant 0 : index
    %c0_68 = arith.constant 0 : index
    %82 = vector.load %arg11[%c0_67, %c0_68] : memref<1x96xf32, #tpu.memory_space<vmem>>, vector<1x96xf32>
    %83 = vector.broadcast %82 : vector<1x96xf32> to vector<3x96xf32>
    %84 = arith.addf %81, %83 : vector<3x96xf32>
    %cst_69 = arith.constant 0.000000e+00 : f32
    %85 = vector.broadcast %cst_69 : f32 to vector<3x96xf32>
    %86 = arith.maximumf %84, %85 : vector<3x96xf32>
    %c0_70 = arith.constant 0 : index
    %c0_71 = arith.constant 0 : index
    %87 = vector.load %arg12[%c0_70, %c0_71] : memref<1x3xf32, #tpu.memory_space<vmem>>, vector<1x3xf32>
    %cst_72 = arith.constant dense<0.000000e+00> : vector<1x96xf32>
    %88 = tpu.matmul %87, %86, %cst_72 {dimension_numbers = #tpu.dot_dimension_numbers<[1], [0], [0], [1], [0, 0, 1, 1], [], []>} : vector<1x3xf32>, vector<3x96xf32>, vector<1x96xf32> -> vector<1x96xf32>
    %c0_73 = arith.constant 0 : index
    %c0_74 = arith.constant 0 : index
    %89 = vector.load %arg13[%c0_73, %c0_74] : memref<96x32xf32, #tpu.memory_space<vmem>>, vector<96x32xf32>
    %cst_75 = arith.constant dense<0.000000e+00> : vector<1x32xf32>
    %90 = tpu.matmul %88, %89, %cst_75 {dimension_numbers = #tpu.dot_dimension_numbers<[1], [0], [0], [1], [0, 0, 1, 1], [], []>} : vector<1x96xf32>, vector<96x32xf32>, vector<1x32xf32> -> vector<1x32xf32>
    %c0_76 = arith.constant 0 : index
    %c0_77 = arith.constant 0 : index
    %91 = vector.load %arg14[%c0_76, %c0_77] : memref<32x120xf32, #tpu.memory_space<vmem>>, vector<32x120xf32>
    %cst_78 = arith.constant dense<0.000000e+00> : vector<1x120xf32>
    %92 = tpu.matmul %90, %91, %cst_78 {dimension_numbers = #tpu.dot_dimension_numbers<[1], [0], [0], [1], [0, 0, 1, 1], [], []>} : vector<1x32xf32>, vector<32x120xf32>, vector<1x120xf32> -> vector<1x120xf32>
    %c0_79 = arith.constant 0 : index
    %c0_80 = arith.constant 0 : index
    %93 = vector.load %arg15[%c0_79, %c0_80] : memref<1x120xf32, #tpu.memory_space<vmem>>, vector<1x120xf32>
    %94 = arith.addf %92, %93 : vector<1x120xf32>
    %cst_81 = arith.constant 0.000000e+00 : f32
    %95 = vector.broadcast %cst_81 : f32 to vector<1x120xf32>
    %96 = arith.maximumf %94, %95 : vector<1x120xf32>
    %c0_82 = arith.constant 0 : index
    %c0_83 = arith.constant 0 : index
    %97 = vector.load %arg16[%c0_82, %c0_83] : memref<120x84xf32, #tpu.memory_space<vmem>>, vector<120x84xf32>
    %cst_84 = arith.constant dense<0.000000e+00> : vector<1x84xf32>
    %98 = tpu.matmul %96, %97, %cst_84 {dimension_numbers = #tpu.dot_dimension_numbers<[1], [0], [0], [1], [0, 0, 1, 1], [], []>} : vector<1x120xf32>, vector<120x84xf32>, vector<1x84xf32> -> vector<1x84xf32>
    %c0_85 = arith.constant 0 : index
    %c0_86 = arith.constant 0 : index
    %99 = vector.load %arg17[%c0_85, %c0_86] : memref<1x84xf32, #tpu.memory_space<vmem>>, vector<1x84xf32>
    %100 = arith.addf %98, %99 : vector<1x84xf32>
    %cst_87 = arith.constant 0.000000e+00 : f32
    %101 = vector.broadcast %cst_87 : f32 to vector<1x84xf32>
    %102 = arith.maximumf %100, %101 : vector<1x84xf32>
    %c0_88 = arith.constant 0 : index
    %c0_89 = arith.constant 0 : index
    %103 = vector.load %arg18[%c0_88, %c0_89] : memref<84x8xf32, #tpu.memory_space<vmem>>, vector<84x8xf32>
    %cst_90 = arith.constant dense<0.000000e+00> : vector<1x8xf32>
    %104 = tpu.matmul %102, %103, %cst_90 {dimension_numbers = #tpu.dot_dimension_numbers<[1], [0], [0], [1], [0, 0, 1, 1], [], []>} : vector<1x84xf32>, vector<84x8xf32>, vector<1x8xf32> -> vector<1x8xf32>
    %c0_91 = arith.constant 0 : index
    %c0_92 = arith.constant 0 : index
    %105 = vector.load %arg19[%c0_91, %c0_92] : memref<1x8xf32, #tpu.memory_space<vmem>>, vector<1x8xf32>
    %106 = arith.addf %104, %105 : vector<1x8xf32>
    %cst_93 = arith.constant dense<0xFF800000> : vector<1xf32>
    %107 = vector.multi_reduction <maximumf>, %106, %cst_93 [1] : vector<1x8xf32> to vector<1xf32>
    %108 = vector.shape_cast %107 : vector<1xf32> to vector<1x1xf32>
    %109 = vector.broadcast %108 : vector<1x1xf32> to vector<1x8xf32>
    %110 = arith.subf %106, %109 : vector<1x8xf32>
    %111 = math.exp %110 : vector<1x8xf32>
    %cst_94 = arith.constant dense<0.000000e+00> : vector<1xf32>
    %112 = vector.multi_reduction <add>, %111, %cst_94 [1] : vector<1x8xf32> to vector<1xf32>
    %113 = vector.shape_cast %112 : vector<1xf32> to vector<1x1xf32>
    %114 = tpu.reciprocal %113 {approx = true} : vector<1x1xf32> -> vector<1x1xf32>
    %115 = vector.broadcast %114 : vector<1x1xf32> to vector<1x8xf32>
    %116 = arith.mulf %111, %115 : vector<1x8xf32>
    %c0_95 = arith.constant 0 : index
    %c0_96 = arith.constant 0 : index
    %c0_97 = arith.constant 0 : index
    %117 = vector.load %arg20[%c0_95, %c0_96, %c0_97] : memref<1x1x8xf32, #tpu.memory_space<vmem>>, vector<1x1x8xf32>
    %118 = vector.shape_cast %117 : vector<1x1x8xf32> to vector<1x8xf32>
    %119 = vector.shape_cast %116 : vector<1x8xf32> to vector<1x1x8xf32>
    tpu.vector_store %arg20[%c0_95, %c0_96, %c0_97], %119 {strides = array<i32>} : memref<1x1x8xf32, #tpu.memory_space<vmem>>, vector<1x1x8xf32>,
    return
  }
  func.func @transform_0(%arg0: i32) -> (i32, i32, i32) {
    %c0_i32 = arith.constant 0 : i32
    %c0_i32_0 = arith.constant 0 : i32
    %c0_i32_1 = arith.constant 0 : i32
    return %arg0, %c0_i32, %c0_i32_0 : i32, i32, i32
  }
  func.func @transform_1(%arg0: i32) -> (i32, i32, i32) {
    %c0_i32 = arith.constant 0 : i32
    %c0_i32_0 = arith.constant 0 : i32
    %c0_i32_1 = arith.constant 0 : i32
    %c0_i32_2 = arith.constant 0 : i32
    return %c0_i32, %c0_i32_0, %c0_i32_1 : i32, i32, i32
  }
  func.func @transform_2(%arg0: i32) -> (i32, i32) {
    %c0_i32 = arith.constant 0 : i32
    %c0_i32_0 = arith.constant 0 : i32
    %c0_i32_1 = arith.constant 0 : i32
    return %c0_i32, %c0_i32_0 : i32, i32
  }
  func.func @transform_3(%arg0: i32) -> (i32, i32) {
    %c0_i32 = arith.constant 0 : i32
    %c0_i32_0 = arith.constant 0 : i32
    %c0_i32_1 = arith.constant 0 : i32
    return %c0_i32, %c0_i32_0 : i32, i32
  }
  func.func @transform_4(%arg0: i32) -> (i32, i32) {
    %c0_i32 = arith.constant 0 : i32
    %c0_i32_0 = arith.constant 0 : i32
    %c0_i32_1 = arith.constant 0 : i32
    return %c0_i32, %c0_i32_0 : i32, i32
  }
  func.func @transform_5(%arg0: i32) -> (i32, i32, i32) {
    %c0_i32 = arith.constant 0 : i32
    %c0_i32_0 = arith.constant 0 : i32
    %c0_i32_1 = arith.constant 0 : i32
    %c0_i32_2 = arith.constant 0 : i32
    return %c0_i32, %c0_i32_0, %c0_i32_1 : i32, i32, i32
  }
  func.func @transform_6(%arg0: i32) -> (i32, i32) {
    %c0_i32 = arith.constant 0 : i32
    %c0_i32_0 = arith.constant 0 : i32
    %c0_i32_1 = arith.constant 0 : i32
    return %c0_i32, %c0_i32_0 : i32, i32
  }
  func.func @transform_7(%arg0: i32) -> (i32, i32) {
    %c0_i32 = arith.constant 0 : i32
    %c0_i32_0 = arith.constant 0 : i32
    %c0_i32_1 = arith.constant 0 : i32
    return %c0_i32, %c0_i32_0 : i32, i32
  }
  func.func @transform_8(%arg0: i32) -> (i32, i32) {
    %c0_i32 = arith.constant 0 : i32
    %c0_i32_0 = arith.constant 0 : i32
    %c0_i32_1 = arith.constant 0 : i32
    return %c0_i32, %c0_i32_0 : i32, i32
  }
  func.func @transform_9(%arg0: i32) -> (i32, i32, i32) {
    %c0_i32 = arith.constant 0 : i32
    %c0_i32_0 = arith.constant 0 : i32
    %c0_i32_1 = arith.constant 0 : i32
    %c0_i32_2 = arith.constant 0 : i32
    return %c0_i32, %c0_i32_0, %c0_i32_1 : i32, i32, i32
  }
  func.func @transform_10(%arg0: i32) -> (i32, i32) {
    %c0_i32 = arith.constant 0 : i32
    %c0_i32_0 = arith.constant 0 : i32
    %c0_i32_1 = arith.constant 0 : i32
    return %c0_i32, %c0_i32_0 : i32, i32
  }
  func.func @transform_11(%arg0: i32) -> (i32, i32) {
    %c0_i32 = arith.constant 0 : i32
    %c0_i32_0 = arith.constant 0 : i32
    %c0_i32_1 = arith.constant 0 : i32
    return %c0_i32, %c0_i32_0 : i32, i32
  }
  func.func @transform_12(%arg0: i32) -> (i32, i32) {
    %c0_i32 = arith.constant 0 : i32
    %c0_i32_0 = arith.constant 0 : i32
    %c0_i32_1 = arith.constant 0 : i32
    return %c0_i32, %c0_i32_0 : i32, i32
  }
  func.func @transform_13(%arg0: i32) -> (i32, i32) {
    %c0_i32 = arith.constant 0 : i32
    %c0_i32_0 = arith.constant 0 : i32
    %c0_i32_1 = arith.constant 0 : i32
    return %c0_i32, %c0_i32_0 : i32, i32
  }
  func.func @transform_14(%arg0: i32) -> (i32, i32) {
    %c0_i32 = arith.constant 0 : i32
    %c0_i32_0 = arith.constant 0 : i32
    %c0_i32_1 = arith.constant 0 : i32
    return %c0_i32, %c0_i32_0 : i32, i32
  }
  func.func @transform_15(%arg0: i32) -> (i32, i32) {
    %c0_i32 = arith.constant 0 : i32
    %c0_i32_0 = arith.constant 0 : i32
    %c0_i32_1 = arith.constant 0 : i32
    return %c0_i32, %c0_i32_0 : i32, i32
  }
  func.func @transform_16(%arg0: i32) -> (i32, i32) {
    %c0_i32 = arith.constant 0 : i32
    %c0_i32_0 = arith.constant 0 : i32
    %c0_i32_1 = arith.constant 0 : i32
    return %c0_i32, %c0_i32_0 : i32, i32
  }
  func.func @transform_17(%arg0: i32) -> (i32, i32) {
    %c0_i32 = arith.constant 0 : i32
    %c0_i32_0 = arith.constant 0 : i32
    %c0_i32_1 = arith.constant 0 : i32
    return %c0_i32, %c0_i32_0 : i32, i32
  }
  func.func @transform_18(%arg0: i32) -> (i32, i32) {
    %c0_i32 = arith.constant 0 : i32
    %c0_i32_0 = arith.constant 0 : i32
    %c0_i32_1 = arith.constant 0 : i32
    return %c0_i32, %c0_i32_0 : i32, i32
  }
  func.func @transform_19(%arg0: i32) -> (i32, i32, i32) {
    %c0_i32 = arith.constant 0 : i32
    %c0_i32_0 = arith.constant 0 : i32
    %c0_i32_1 = arith.constant 0 : i32
    return %arg0, %c0_i32, %c0_i32_0 : i32, i32, i32
  }
}

</mosaic_0001>

<bundles_post_ra>
// kernel: lenet_forward.1
= control target key start
LH: loop header
LB: loop body
LE: loop exit
PB: predicated region body
PF: predicated region fallthrough
CT: control target
= control target key end

     0   :  { %s4019_s0 = inlined_call_operand.vmem [shape: f32[2,32,96], index: 0, kind: input, shape index: {}]   ;;  %s4020_s1 = inlined_call_operand.vmem [shape: f32[5,96,168], index: 1, kind: input, shape index: {}]   ;;  %s4021_s2 = inlined_call_operand.vmem [shape: f32[1,168], index: 2, kind: input, shape index: {}]   ;;  %s4022_s3 = inlined_call_operand.vmem [shape: f32[14,28], index: 3, kind: input, shape index: {}]   ;;  %s4023_s4 = inlined_call_operand.vmem [shape: f32[168,84], index: 4, kind: input, shape index: {}]   ;;  %s4024_s5 = inlined_call_operand.vmem [shape: f32[5,84,160], index: 5, kind: input, shape index: {}]   ;;  %s4025_s6 = inlined_call_operand.vmem [shape: f32[1,160], index: 6, kind: input, shape index: {}]   ;;  %s4026_s7 = inlined_call_operand.vmem [shape: f32[5,10], index: 7, kind: input, shape index: {}]   ;;  %s4027_s8 = inlined_call_operand.vmem [shape: f32[160,80], index: 8, kind: input, shape index: {}]   ;;  %s4028_s9 = inlined_call_operand.vmem [shape: f32[3,80,96], index: 9, kind: input, shape index: {}]   ;;  %s4029_s10 = inlined_call_operand.vmem [shape: f32[1,96], index: 10, kind: input, shape index: {}]   ;;  %s4030_s11 = inlined_call_operand.vmem [shape: f32[1,3], index: 11, kind: input, shape index: {}]   ;;  %s4031_s12 = inlined_call_operand.vmem [shape: f32[96,32], index: 12, kind: input, shape index: {}]   ;;  %s4032_s13 = inlined_call_operand.vmem [shape: f32[32,120], index: 13, kind: input, shape index: {}]   ;;  %s4033_s14 = inlined_call_operand.vmem [shape: f32[1,120], index: 14, kind: input, shape index: {}]   ;;  %s4034_s15 = inlined_call_operand.vmem [shape: f32[120,84], index: 15, kind: input, shape index: {}]   ;;  %s4035_s16 = inlined_call_operand.vmem [shape: f32[1,84], index: 16, kind: input, shape index: {}]   ;;  %s4036_s17 = inlined_call_operand.vmem [shape: f32[84,8], index: 17, kind: input, shape index: {}]   ;;  %s4037_s18 = inlined_call_operand.vmem [shape: f32[1,8], index: 18, kind: input, shape index: {}]   ;;  %s4038_s19 = inlined_call_operand.hbm [shape: f32[2,1,8], index: 19, kind: output, shape index: {}]  }
   0x1   :  { %4050 = sst [smem:[#allocation12_spill]] %s4019_s0 }
   0x2   :  { %4051 = sst [smem:[#allocation13_spill]] %s4020_s1 }
   0x3   :  { %4052 = sst [smem:[#allocation14_spill]] %s4021_s2 }
   0x4   :  { %4053 = sst [smem:[#allocation15_spill]] %s4022_s3 }
   0x5   :  { %4054 = sst [smem:[#allocation16_spill]] %s4023_s4 }
   0x6   :  { %4055 = sst [smem:[#allocation17_spill]] %s4024_s5 }
   0x7   :  { %4056 = sst [smem:[#allocation18_spill]] %s4025_s6 }
   0x8   :  { %4057 = sst [smem:[#allocation19_spill]] %s4038_s19 }
   0x9   :  { %24 = vsyncpa [#allocation3], 0 }
   0xa   :  { %26 = vsyncpa [#allocation3 + $0x1], 0  ;;  %s2703_s0 = smov 0   ;;  %s2705_s30 = smov 0  }
   0xb   :  { %s2707_s20 = smov 0   ;;  %s2709_s21 = smov 0  }
   0xc LB: > { %4058 = sst [smem:[#allocation5_spill]] %s2589_s0  ;;  %s2724_s1 = sadd.s32 4294967295, %s2601_s21   ;;  %s2601_s21 = sphi %s2709_s21, %s4080_s21   ;;  %s2597_s20 = sphi %s2707_s20, %s4082_s20   ;;  %s2593_s30 = sphi %s2705_s30, %s4084_s30   ;;  %s2589_s0 = sphi %s2703_s0, %s4083_s0  }
   0xd   : > { %4059 = sst [smem:[#allocation6_spill]] %s2597_s20  ;;  %s2189_s22 = sadd.s32 4294967294, %s2601_s21  }
   0xe   : > { %4060 = sst [smem:[#allocation7_spill]] %s2601_s21  ;;  %s2728_s2 = sadd.s32 1, %s2601_s21  }
   0xf   : > { %4061 = sst [smem:[#allocation8_spill]] %s2728_s2  ;;  %s443_s23 = sadd.s32 1, %s2597_s20 }
  0x10   : > { %s440_s24 = ssub.s32 %s2601_s21, %s2728_s2  ;;  %p453_p0 = scmp.ne.s32.totalorder %s2597_s20, %s2593_s30 }
  0x11   : > { %p441_p1 = scmp.eq.s32.totalorder %s440_s24, 0  ;;  %p454_p2 = scmp.eq.s32.totalorder %s2724_s1, 1 }
  0x12   : > { %p459_p3 = scmp.ne.s32.totalorder %s2593_s30, %s2589_s0  ;;  %p460_p4 = scmp.eq.s32.totalorder %s2189_s22, 1 }
  0x13   : > { %s2739_s25 = scalar_select %p441_p1, %s2597_s20, %s443_s23  }
  0x14   : > { %p2741_p5 = por %p454_p2, %p453_p0  ;;  %p2745_p6 = por %p460_p4, %p459_p3 }
  0x15   : > { %4062 = sst [smem:[#allocation9_spill]] %s2739_s25  ;;  %p2192_p7 = scmp.ge.s32.totalorder %s2601_s21, 1 }
  0x16   : > { %s4063_s3 = scalar_select %p2741_p5, 1, 0 }
  0x17   : > { %s4065_s26 = scalar_select %p2745_p6, 1, 0 }
  0x18   : > { %4064 = sst [smem:[#allocation10_spill]] %s4063_s3  ;;  %p540_p8 = scmp.lt.s32.totalorder %s2601_s21, 3 }
  0x19   : > { %4066 = sst [smem:[#allocation11_spill]] %s4065_s26 }
  0x1a   : > { %p541_p9 = pnand %p2192_p7, %p540_p8 }
  0x1b   : > { %s4067_s29 = sld [smem:[#allocation13_spill]] (!%p541_p9)  ;;  %p595_p10 = scmp.lt.s32.totalorder (!%p541_p9), %s2724_s1, 1 }
  0x1c   : > { %544 = sbr.rel (%p541_p9) target bundleno = 2061 (0x80d), region = 96  ;;  %s4068_s19 = sld [smem:[#allocation12_spill]] (!%p541_p9) }
  0x1d   : > { %s4069_s4 = sld [smem:[#allocation16_spill]] (!%p541_p9)  ;;  %s593_s21 = sand.u32 (!%p541_p9), 1, %s2593_s30  }
  0x1e   : > { %s4070_s24 = sld [smem:[#allocation14_spill]] (!%p541_p9)  ;;  %s594_s28 = scalar_lea.vmem (!%p541_p9), [#allocation2], %s593_s21 }
  0x1f   : > { %s4071_s0 = sld [smem:[#allocation15_spill]] (!%p541_p9) }
  0x20   : > { %s4073_s5 = sld [smem:[#allocation17_spill]] (!%p541_p9) }
  0x21   : > { %v2217_v0 = vld [vmem:[%s4067_s29 + $0x170] sm:$0xff]  ;;  %v2218_v1 = vld [vmem:[%s4067_s29 + $0x178] sm:$0xff]  ;;  %v2215_v4 = vld [vmem:[%s4067_s29 + $0x160] sm:$0xff]  ;;  %s2809_s20 = scalar_select %p595_p10, %s2724_s1, 1  ;;  %vm657_vm0 = vcmask 1046528   ;;  %vm665_vm1 = vcmask 785408  }
  0x22   : > { %v626_v2 = vld [vmem:[%s4067_s29 + $0xb0] sm:$0xff]  ;;  %678 = vmatpush.msra.mxu0 %v2217_v0  ;;  %707 = vmatpush.msra.mxu1 %v2218_v1  ;;  %v627_v3 = vld [vmem:[%s4067_s29 + $0xb8] sm:$0xff]  ;;  %v2216_v5 = vld [vmem:[%s4067_s29 + $0x168] sm:$0xff]  ;;  %vm823_vm2 = vcmask 1045504   ;;  %vm930_vm3 = vcmask 1044480   ;;  %vm1037_vm4 = vcmask 1043456  }
  0x23   : > { %744 = vmatpush.msra.mxu2 %v626_v2  ;;  %773 = vmatpush.msra.mxu3 %v627_v3  ;;  %v624_v6 = vld [vmem:[%s4067_s29 + $0xa0] sm:$0xff]  ;;  %v625_v7 = vld [vmem:[%s4067_s29 + $0xa8] sm:$0xff]  ;;  %v2213_v8 = vld [vmem:[%s4067_s29 + $0x150] sm:$0xff]  ;;  %s2494_s23 = sshll.u32 %s2809_s20, 5  ;;  %vm1143_vm5 = vcmask 228352   ;;  %vm1223_vm6 = vcmask 326656  }
  0x24   : > { %679 = vmatpush.msra.mxu0 %v2215_v4  ;;  %708 = vmatpush.msra.mxu1 %v2216_v5  ;;  %v2214_v9 = vld [vmem:[%s4067_s29 + $0x158] sm:$0xff]  ;;  %v622_v10 = vld [vmem:[%s4067_s29 + $0x90] sm:$0xff]  ;;  %v2211_v12 = vld [vmem:[%s4067_s29 + $0x140] sm:$0xff]  ;;  %s2857_s3 = scalar_lea.vmem %s4068_s19, %s2494_s23  ;;  %vm1326_vm7 = vcmask 687104   ;;  %s4074_s6 = sld [smem:[#allocation18_spill]]  ;;  %vm1716_vm8 = vcmask 1041408  }
  0x25   : > { %v623_v11 = vld [vmem:[%s4067_s29 + $0x98] sm:$0xff]  ;;  %745 = vmatpush.msra.mxu2 %v624_v6  ;;  %774 = vmatpush.msra.mxu3 %v625_v7  ;;  %v2212_v13 = vld [vmem:[%s4067_s29 + $0x148] sm:$0xff]  ;;  %v620_v14 = vld [vmem:[%s4067_s29 + $0x80] sm:$0xff]  ;;  %s4072_s26 = smov %s4071_s0  ;;  %vm1712_vm9 = vcmask 80896   ;;  %vm1783_vm10 = vcmask 261120   ;;  %vm1850_vm11 = vcmask 654336  }
  0x26   : > { %680 = vmatpush.msra.mxu0 %v2213_v8  ;;  %709 = vmatpush.msra.mxu1 %v2214_v9  ;;  %v621_v15 = vld [vmem:[%s4067_s29 + $0x88] sm:$0xff]  ;;  %v2209_v16 = vld [vmem:[%s4067_s29 + $0x130] sm:$0xff]  ;;  %v2210_v17 = vld [vmem:[%s4067_s29 + $0x138] sm:$0xff]  ;;  %vm1941_vm12 = vcmask 1042432   ;;  %vm1937_vm13 = vcmask 23552   ;;  %vm2045_vm14 = vcmask 982016  }
  0x27   : > { %746 = vmatpush.msra.mxu2 %v622_v10  ;;  %775 = vmatpush.msra.mxu3 %v623_v11  ;;  %v618_v18 = vld [vmem:[%s4067_s29 + $0x70] sm:$0xff]  ;;  %v619_v19 = vld [vmem:[%s4067_s29 + $0x78] sm:$0xff]  ;;  %v2207_v20 = vld [vmem:[%s4067_s29 + $0x120] sm:$0xff]  ;;  %vm2108_vm15 = vcmask 57344   ;;  %s2132_s20 = sshll.u32 %s594_s28, 4  ;;  %s2122_s19 = scalar_lea.sflag [#allocation3], %s593_s21  ;;  %s2133_s20 = int_to_ptr.vmem [resolvable:$true] %s2132_s20 }
  0x28   : > { %681 = vmatpush.msra.mxu0 %v2211_v12  ;;  %710 = vmatpush.msra.mxu1 %v2212_v13  ;;  %v2208_v21 = vld [vmem:[%s4067_s29 + $0x128] sm:$0xff]  ;;  %v616_v22 = vld [vmem:[%s4067_s29 + $0x60] sm:$0xff]  ;;  %v2205_v24 = vld [vmem:[%s4067_s29 + $0x110] sm:$0xff] }
  0x29   : > { %747 = vmatpush.msra.mxu2 %v620_v14  ;;  %776 = vmatpush.msra.mxu3 %v621_v15  ;;  %v617_v23 = vld [vmem:[%s4067_s29 + $0x68] sm:$0xff]  ;;  %v2206_v25 = vld [vmem:[%s4067_s29 + $0x118] sm:$0xff]  ;;  %v614_v26 = vld [vmem:[%s4067_s29 + $0x50] sm:$0xff] }
  0x2a   : > { %682 = vmatpush.msra.mxu0 %v2209_v16  ;;  %711 = vmatpush.msra.mxu1 %v2210_v17  ;;  %v615_v27 = vld [vmem:[%s4067_s29 + $0x58] sm:$0xff]  ;;  %v2203_v28 = vld [vmem:[%s4067_s29 + $0x100] sm:$0xff]  ;;  %v2204_v29 = vld [vmem:[%s4067_s29 + $0x108] sm:$0xff] }
  0x2b   : > { %748 = vmatpush.msra.mxu2 %v618_v18  ;;  %777 = vmatpush.msra.mxu3 %v619_v19  ;;  %v612_v30 = vld [vmem:[%s4067_s29 + $0x40] sm:$0xff]  ;;  %v613_v31 = vld [vmem:[%s4067_s29 + $0x48] sm:$0xff]  ;;  %v2201_v32 = vld [vmem:[%s4067_s29 + $0xf0] sm:$0xff] }
  0x2c   : > { %683 = vmatpush.msra.mxu0 %v2207_v20  ;;  %712 = vmatpush.msra.mxu1 %v2208_v21  ;;  %v2202_v33 = vld [vmem:[%s4067_s29 + $0xf8] sm:$0xff]  ;;  %v610_v34 = vld [vmem:[%s4067_s29 + $0x30] sm:$0xff]  ;;  %v2199_v36 = vld [vmem:[%s4067_s29 + $0xe0] sm:$0xff] }
  0x2d   : > { %749 = vmatpush.msra.mxu2 %v616_v22  ;;  %778 = vmatpush.msra.mxu3 %v617_v23  ;;  %v611_v35 = vld [vmem:[%s4067_s29 + $0x38] sm:$0xff]  ;;  %v2200_v37 = vld [vmem:[%s4067_s29 + $0xe8] sm:$0xff]  ;;  %v2878_v38 = vld [vmem:[%s2857_s3] sm:$0xff] }
  0x2e   : > { %684 = vmatpush.msra.mxu0 %v2205_v24  ;;  %713 = vmatpush.msra.mxu1 %v2206_v25  ;;  %v2881_v39 = vld [vmem:[%s2857_s3 + $0x8] sm:$0xff]  ;;  %v608_v40 = vld [vmem:[%s4067_s29 + $0x20] sm:$0xff]  ;;  %v2197_v42 = vld [vmem:[%s4067_s29 + $0xd0] sm:$0xff]  ;;  %v658_v44 = vrot.slane %v2878_v38, 1 }
  0x2f   : > { %750 = vmatpush.msra.mxu2 %v614_v26  ;;  %779 = vmatpush.msra.mxu3 %v615_v27  ;;  %v609_v41 = vld [vmem:[%s4067_s29 + $0x28] sm:$0xff]  ;;  %v2198_v43 = vld [vmem:[%s4067_s29 + $0xd8] sm:$0xff]  ;;  %v659_v45 = vrot.slane %v2881_v39, 1  ;;  %v606_v46 = vld [vmem:[%s4067_s29 + $0x10] sm:$0xff] }
  0x30   : > { %685 = vmatpush.msra.mxu0 %v2203_v28  ;;  %714 = vmatpush.msra.mxu1 %v2204_v29  ;;  %v607_v47 = vld [vmem:[%s4067_s29 + $0x18] sm:$0xff]  ;;  %v2195_v48 = vld [vmem:[%s4067_s29 + $0xc0] sm:$0xff]  ;;  %v2196_v49 = vld [vmem:[%s4067_s29 + $0xc8] sm:$0xff] }
  0x31   : > { %751 = vmatpush.msra.mxu2 %v612_v30  ;;  %780 = vmatpush.msra.mxu3 %v613_v31  ;;  %v604_v50 = vld [vmem:[%s4067_s29] sm:$0xff]  ;;  %v605_v51 = vld [vmem:[%s4067_s29 + $0x8] sm:$0xff]  ;;  %v660_v52 = vsel %vm657_vm0, %v658_v44, %v659_v45  ;;  %v2917_v53 = vld [vmem:[%s2857_s3 + $0x10] sm:$0xff]  ;;  %v932_v44 = vrot.slane %v2881_v39, 3 }
  0x32   : > { %686 = vmatpush.msra.mxu0 %v2201_v32  ;;  %715 = vmatpush.msra.mxu1 %v2202_v33  ;;  %v2257_v54 = vld [vmem:[%s4067_s29 + $0x230] sm:$0xff]  ;;  %v2258_v55 = vld [vmem:[%s4067_s29 + $0x238] sm:$0xff]  ;;  %v661_v58 = vrot.slane %v2917_v53, 1  ;;  %v2255_v59 = vld [vmem:[%s4067_s29 + $0x220] sm:$0xff] }
  0x33   : > { %752 = vmatpush.msra.mxu2 %v610_v34  ;;  %781 = vmatpush.msra.mxu3 %v611_v35  ;;  %v2289_v56 = vld [vmem:[%s4067_s29 + $0x2f0] sm:$0xff]  ;;  %v2290_v57 = vld [vmem:[%s4067_s29 + $0x2f8] sm:$0xff]  ;;  %v2256_v60 = vld [vmem:[%s4067_s29 + $0x228] sm:$0xff] }
  0x34   : > { %687 = vmatpush.msra.mxu0 %v2199_v36  ;;  %716 = vmatpush.msra.mxu1 %v2200_v37  ;;  %v2287_v61 = vld [vmem:[%s4067_s29 + $0x2e0] sm:$0xff]  ;;  %v2288_v62 = vld [vmem:[%s4067_s29 + $0x2e8] sm:$0xff]  ;;  %v2253_v63 = vld [vmem:[%s4067_s29 + $0x210] sm:$0xff]  ;;  %v662_v3 = vsel %vm657_vm0, %v659_v45, %v661_v58  ;;  %v824_v37 = vrot.slane %v2878_v38, 2 }
  0x35   : > { %753 = vmatpush.msra.mxu2 %v608_v40  ;;  %782 = vmatpush.msra.mxu3 %v609_v41  ;;  %v2254_v0 = vld [vmem:[%s4067_s29 + $0x218] sm:$0xff]  ;;  %v2285_v1 = vld [vmem:[%s4067_s29 + $0x2d0] sm:$0xff]  ;;  %v2251_v5 = vld [vmem:[%s4067_s29 + $0x200] sm:$0xff]  ;;  %v825_v40 = vrot.slane %v2881_v39, 2 }
  0x36   : > { %688 = vmatpush.msra.mxu0 %v2197_v42  ;;  %717 = vmatpush.msra.mxu1 %v2198_v43  ;;  %v2286_v2 = vld [vmem:[%s4067_s29 + $0x2d8] sm:$0xff]  ;;  %v2252_v6 = vld [vmem:[%s4067_s29 + $0x208] sm:$0xff]  ;;  %v2283_v7 = vld [vmem:[%s4067_s29 + $0x2c0] sm:$0xff]  ;;  %v931_v43 = vrot.slane %v2878_v38, 3 }
  0x37   : > { %754 = vmatpush.msra.mxu2 %v606_v46  ;;  %783 = vmatpush.msra.mxu3 %v607_v47  ;;  %v2964_v4 = vld [vmem:[%s2857_s3 + $0x18] sm:$0xff]  ;;  %v2284_v8 = vld [vmem:[%s4067_s29 + $0x2c8] sm:$0xff]  ;;  %v2249_v10 = vld [vmem:[%s4067_s29 + $0x1f0] sm:$0xff]  ;;  %s4076_s3 = sld [smem:[#allocation19_spill]] }
  0x38   : > { %689 = vmatpush.msra.mxu0 %v2195_v48  ;;  %718 = vmatpush.msra.mxu1 %v2196_v49  ;;  %v663_v9 = vrot.slane %v2964_v4, 1  ;;  %v2250_v11 = vld [vmem:[%s4067_s29 + $0x1f8] sm:$0xff]  ;;  %v2281_v12 = vld [vmem:[%s4067_s29 + $0x2b0] sm:$0xff]  ;;  %v2247_v14 = vld [vmem:[%s4067_s29 + $0x1e0] sm:$0xff]  ;;  %v826_v49 = vsel %vm823_vm2, %v824_v37, %v825_v40 }
  0x39   : > { %755 = vmatpush.msra.mxu2 %v604_v50  ;;  %784 = vmatpush.msra.mxu3 %v605_v51  ;;  %v2282_v13 = vld [vmem:[%s4067_s29 + $0x2b8] sm:$0xff]  ;;  %v2248_v15 = vld [vmem:[%s4067_s29 + $0x1e8] sm:$0xff]  ;;  %v2279_v16 = vld [vmem:[%s4067_s29 + $0x2a0] sm:$0xff]  ;;  %v933_v50 = vsel %vm930_vm3, %v931_v43, %v932_v44  ;;  %v1038_v51 = vrot.slane %v2878_v38, 4 }
  0x3a   : > { %2219 = vmatmul.msk.f32.vlgmr.msra.gmra.mxu0 %vm665_vm1, %v660_v52  ;;  %2223 = vmatmul.msk.f32.vlgmr.msra.gmra.mxu1 %vm665_vm1, %v660_v52  ;;  %v2280_v17 = vld [vmem:[%s4067_s29 + $0x2a8] sm:$0xff]  ;;  %v664_v18 = vsel %vm657_vm0, %v661_v58, %v663_v9  ;;  %v2245_v19 = vld [vmem:[%s4067_s29 + $0x1d0] sm:$0xff]  ;;  %v2246_v20 = vld [vmem:[%s4067_s29 + $0x1d8] sm:$0xff]  ;;  %v1039_v52 = vrot.slane %v2881_v39, 4 }
  0x3b   : > { %2227 = vmatmul.msk.f32.vlgmr.msra.gmra.mxu2 %vm665_vm1, %v2878_v38  ;;  %2231 = vmatmul.msk.f32.vlgmr.msra.gmra.mxu3 %vm665_vm1, %v2878_v38  ;;  %v2277_v21 = vld [vmem:[%s4067_s29 + $0x290] sm:$0xff]  ;;  %v2278_v22 = vld [vmem:[%s4067_s29 + $0x298] sm:$0xff]  ;;  %v2243_v23 = vld [vmem:[%s4067_s29 + $0x1c0] sm:$0xff]  ;;  %v1041_v38 = vrot.slane %v2917_v53, 4 }
  0x3c   : > { %843 = vmatpush.msrb.mxu0 %v2257_v54  ;;  %872 = vmatpush.msrb.mxu1 %v2258_v55  ;;  %v2244_v24 = vld [vmem:[%s4067_s29 + $0x1c8] sm:$0xff]  ;;  %v2275_v25 = vld [vmem:[%s4067_s29 + $0x280] sm:$0xff]  ;;  %v2241_v27 = vld [vmem:[%s4067_s29 + $0x1b0] sm:$0xff] }
  0x3d   : > { %950 = vmatpush.msrb.mxu2 %v2289_v56  ;;  %979 = vmatpush.msrb.mxu3 %v2290_v57  ;;  %v2276_v26 = vld [vmem:[%s4067_s29 + $0x288] sm:$0xff]  ;;  %v2242_v28 = vld [vmem:[%s4067_s29 + $0x1b8] sm:$0xff]  ;;  %v2273_v29 = vld [vmem:[%s4067_s29 + $0x270] sm:$0xff]  ;;  %v3111_v56 = vsel %vm1037_vm4, %v1038_v51, %v1039_v52  ;;  %s2130_s27 = scalar_lea.hbm %s4076_s3, %s2724_s1  ;;  %s2559_s1 = scalar_lea.hbm %s4076_s3, 2 }
  0x3e   : > { %844 = vmatpush.msrb.mxu0 %v2255_v59  ;;  %873 = vmatpush.msrb.mxu1 %v2256_v60  ;;  %v2274_v30 = vld [vmem:[%s4067_s29 + $0x278] sm:$0xff]  ;;  %v2239_v31 = vld [vmem:[%s4067_s29 + $0x1a0] sm:$0xff]  ;;  %v2240_v32 = vld [vmem:[%s4067_s29 + $0x1a8] sm:$0xff]  ;;  %v934_v59 = vrot.slane %v2917_v53, 3  ;;  %v3125_v60 = vsel %vm1037_vm4, %v1039_v52, %v1041_v38  ;;  %s2134_s22 = sshll.u32 %s2130_s27, 4  ;;  %s2135_s22 = int_to_ptr.hbm [resolvable:$true] %s2134_s22 }
  0x3f   : > { %951 = vmatpush.msrb.mxu2 %v2287_v61  ;;  %980 = vmatpush.msrb.mxu3 %v2288_v62  ;;  %v2271_v33 = vld [vmem:[%s4067_s29 + $0x260] sm:$0xff]  ;;  %v2272_v34 = vld [vmem:[%s4067_s29 + $0x268] sm:$0xff]  ;;  %v2237_v35 = vld [vmem:[%s4067_s29 + $0x190] sm:$0xff]  ;;  %s2553_s23 = sshra.s32 %s2135_s22, 4  ;;  %s2554_s23 = int_to_ptr.hbm [resolvable:$true] %s2553_s23 }
  0x40   : > { %845 = vmatpush.msrb.mxu0 %v2253_v63  ;;  %874 = vmatpush.msrb.mxu1 %v2254_v0  ;;  %v2238_v36 = vld [vmem:[%s4067_s29 + $0x198] sm:$0xff]  ;;  %v2269_v41 = vld [vmem:[%s4067_s29 + $0x250] sm:$0xff]  ;;  %v2235_v45 = vld [vmem:[%s4067_s29 + $0x180] sm:$0xff]  ;;  %v935_v0 = vsel %vm930_vm3, %v932_v44, %v934_v59  ;;  %s2555_s25 = scalar_lea.hbm %s2554_s23, 1  ;;  %p2560_p0 = scmp.lt.s32.totalorder %s2554_s23, %s4076_s3 }
  0x41   : > { %952 = vmatpush.msrb.mxu2 %v2285_v1  ;;  %981 = vmatpush.msrb.mxu3 %v2286_v2  ;;  %v2270_v42 = vld [vmem:[%s4067_s29 + $0x258] sm:$0xff]  ;;  %v2236_v46 = vld [vmem:[%s4067_s29 + $0x188] sm:$0xff]  ;;  %v2267_v47 = vld [vmem:[%s4067_s29 + $0x240] sm:$0xff]  ;;  %v1043_v2 = vrot.slane %v2964_v4, 4  ;;  %p2556_p11 = scmp.ne.s32.totalorder %s2554_s23, %s2555_s25  ;;  %p2561_p1 = scmp.lt.s32.totalorder %s2559_s1, %s2555_s25 }
  0x42   : > { %2220 = vmatmul.msk.f32.gmra.mxu0 %vm665_vm1, %v662_v3  ;;  %2224 = vmatmul.msk.f32.gmra.mxu1 %vm665_vm1, %v662_v3  ;;  %v2268_v48 = vld [vmem:[%s4067_s29 + $0x248] sm:$0xff]  ;;  %v2321_v54 = vld [vmem:[%s4067_s29 + $0x3b0] sm:$0xff]  ;;  %v2322_v55 = vld [vmem:[%s4067_s29 + $0x3b8] sm:$0xff]  ;;  %v829_v3 = vrot.slane %v2964_v4, 2 }
  0x43   : > { %2228 = vmatmul.msk.f32.gmra.mxu2 %vm665_vm1, %v2881_v39  ;;  %2232 = vmatmul.msk.f32.gmra.mxu3 %vm665_vm1, %v2881_v39  ;;  %v827_v39 = vrot.slane %v2917_v53, 2  ;;  %v2319_v57 = vld [vmem:[%s4067_s29 + $0x3a0] sm:$0xff]  ;;  %v2320_v58 = vld [vmem:[%s4067_s29 + $0x3a8] sm:$0xff]  ;;  %v2317_v61 = vld [vmem:[%s4067_s29 + $0x390] sm:$0xff]  ;;  %p2557_p12 = pnand %p2556_p11, %p2741_p5  ;;  %p2562_p2 = por %p2561_p1, %p2560_p0 }
  0x44   : > { %846 = vmatpush.msrb.mxu0 %v2251_v5  ;;  %875 = vmatpush.msrb.mxu1 %v2252_v6  ;;  %v2318_v62 = vld [vmem:[%s4067_s29 + $0x398] sm:$0xff]  ;;  %v2316_v1 = vld [vmem:[%s4067_s29 + $0x388] sm:$0xff]  ;;  %v2313_v5 = vld [vmem:[%s4067_s29 + $0x370] sm:$0xff] }
  0x45   : > { %953 = vmatpush.msrb.mxu2 %v2283_v7  ;;  %982 = vmatpush.msrb.mxu3 %v2284_v8  ;;  %v828_v63 = vsel %vm823_vm2, %v825_v40, %v827_v39  ;;  %v2314_v6 = vld [vmem:[%s4067_s29 + $0x378] sm:$0xff]  ;;  %v936_v7 = vrot.slane %v2964_v4, 3  ;;  %v1044_v8 = vsel %vm1037_vm4, %v1041_v38, %v1043_v2  ;;  %p2558_p13 = pneg %p2557_p12 }
  0x46   : > { %847 = vmatpush.msrb.mxu0 %v2249_v10  ;;  %876 = vmatpush.msrb.mxu1 %v2250_v11  ;;  %v2312_v10 = vld [vmem:[%s4067_s29 + $0x368] sm:$0xff]  ;;  %v830_v11 = vsel %vm823_vm2, %v827_v39, %v829_v3 }
  0x47   : > { %954 = vmatpush.msrb.mxu2 %v2281_v12  ;;  %983 = vmatpush.msrb.mxu3 %v2282_v13  ;;  %v937_v12 = vsel %vm930_vm3, %v934_v59, %v936_v7  ;;  %v2310_v13 = vld [vmem:[%s4067_s29 + $0x358] sm:$0xff]  ;;  %p2563_p3 = pnand %p2562_p2, %p2558_p13 }
  0x48   : > { %848 = vmatpush.msrb.mxu0 %v2247_v14  ;;  %877 = vmatpush.msrb.mxu1 %v2248_v15  ;;  %v2307_v14 = vld [vmem:[%s4067_s29 + $0x340] sm:$0xff]  ;;  %v2308_v15 = vld [vmem:[%s4067_s29 + $0x348] sm:$0xff]  ;;  %v1217_v59 = vld [vmem:[%s4069_s4 + $0x78] sm:$0xff] }
  0x49   : > { %955 = vmatpush.msrb.mxu2 %v2279_v16  ;;  %984 = vmatpush.msrb.mxu3 %v2280_v17  ;;  %v2305_v16 = vld [vmem:[%s4067_s29 + $0x330] sm:$0xff]  ;;  %v2306_v17 = vld [vmem:[%s4067_s29 + $0x338] sm:$0xff] }
  0x4a   : > { %2221 = vmatmul.msk.f32.gmra.mxu0 %vm665_vm1, %v664_v18  ;;  %2225 = vmatmul.msk.f32.gmra.mxu1 %vm665_vm1, %v664_v18  ;;  %v2303_v18 = vld [vmem:[%s4067_s29 + $0x320] sm:$0xff] }
  0x4b   : > { %2229 = vmatmul.msk.f32.gmra.mxu2 %vm665_vm1, %v2917_v53  ;;  %2233 = vmatmul.msk.f32.gmra.mxu3 %vm665_vm1, %v2917_v53  ;;  %v2315_v53 = vld [vmem:[%s4067_s29 + $0x380] sm:$0xff] }
  0x4c   : > { %849 = vmatpush.msrb.mxu0 %v2245_v19  ;;  %878 = vmatpush.msrb.mxu1 %v2246_v20  ;;  %v2304_v19 = vld [vmem:[%s4067_s29 + $0x328] sm:$0xff]  ;;  %v2301_v20 = vld [vmem:[%s4067_s29 + $0x310] sm:$0xff] }
  0x4d   : > { %956 = vmatpush.msrb.mxu2 %v2277_v21  ;;  %985 = vmatpush.msrb.mxu3 %v2278_v22  ;;  %v2302_v21 = vld [vmem:[%s4067_s29 + $0x318] sm:$0xff]  ;;  %v2299_v22 = vld [vmem:[%s4067_s29 + $0x300] sm:$0xff] }
  0x4e   : > { %850 = vmatpush.msrb.mxu0 %v2243_v23  ;;  %879 = vmatpush.msrb.mxu1 %v2244_v24  ;;  %v2300_v23 = vld [vmem:[%s4067_s29 + $0x308] sm:$0xff] }
  0x4f   : > { %957 = vmatpush.msrb.mxu2 %v2275_v25  ;;  %986 = vmatpush.msrb.mxu3 %v2276_v26 }
  0x50   : > { %851 = vmatpush.msrb.mxu0 %v2241_v27  ;;  %880 = vmatpush.msrb.mxu1 %v2242_v28 }
  0x51   : > { %958 = vmatpush.msrb.mxu2 %v2273_v29  ;;  %987 = vmatpush.msrb.mxu3 %v2274_v30 }
  0x52   : > { %2222 = vmatmul.msk.f32.gmra.mxu0 %vm665_vm1, %v663_v9  ;;  %2226 = vmatmul.msk.f32.gmra.mxu1 %vm665_vm1, %v663_v9  ;;  %v2311_v9 = vld [vmem:[%s4067_s29 + $0x360] sm:$0xff] }
  0x53   : > { %2230 = vmatmul.msk.f32.gmra.mxu2 %vm665_vm1, %v2964_v4  ;;  %2234 = vmatmul.msk.f32.gmra.mxu3 %vm665_vm1, %v2964_v4  ;;  %v2309_v4 = vld [vmem:[%s4067_s29 + $0x350] sm:$0xff] }
  0x54   : > { %852 = vmatpush.msrb.mxu0 %v2239_v31  ;;  %881 = vmatpush.msrb.mxu1 %v2240_v32 }
  0x55   : > { %959 = vmatpush.msrb.mxu2 %v2271_v33  ;;  %988 = vmatpush.msrb.mxu3 %v2272_v34 }
  0x56   : > { %853 = vmatpush.msrb.mxu0 %v2237_v35  ;;  %882 = vmatpush.msrb.mxu1 %v2238_v36 }
  0x57   : > { %960 = vmatpush.msrb.mxu2 %v2269_v41  ;;  %989 = vmatpush.msrb.mxu3 %v2270_v42 }
  0x58   : > { %854 = vmatpush.msrb.mxu0 %v2235_v45  ;;  %883 = vmatpush.msrb.mxu1 %v2236_v46 }
  0x59   : > { %961 = vmatpush.msrb.mxu2 %v2267_v47  ;;  %990 = vmatpush.msrb.mxu3 %v2268_v48 }
  0x5a   : > { %2259 = vmatmul.msk.f32.vlgmr.msrb.gmra.mxu0 %vm665_vm1, %v826_v49  ;;  %2263 = vmatmul.msk.f32.vlgmr.msrb.gmra.mxu1 %vm665_vm1, %v826_v49 }
  0x5b   : > { %2291 = vmatmul.msk.f32.vlgmr.msrb.gmra.mxu2 %vm665_vm1, %v933_v50  ;;  %2295 = vmatmul.msk.f32.vlgmr.msrb.gmra.mxu3 %vm665_vm1, %v933_v50 }
  0x5c   : > { %1057 = vmatpush.msra.mxu0 %v2321_v54  ;;  %1086 = vmatpush.msra.mxu1 %v2322_v55 }
  0x5e   : > { %1058 = vmatpush.msra.mxu0 %v2319_v57  ;;  %1087 = vmatpush.msra.mxu1 %v2320_v58 }
  0x60   : > { %1059 = vmatpush.msra.mxu0 %v2317_v61  ;;  %1088 = vmatpush.msra.mxu1 %v2318_v62 }
  0x62   : > { %2260 = vmatmul.msk.f32.gmra.mxu0 %vm665_vm1, %v828_v63  ;;  %2264 = vmatmul.msk.f32.gmra.mxu1 %vm665_vm1, %v828_v63  ;;  %v1215_v63 = vld [vmem:[%s4069_s4 + $0x68] sm:$0xff] }
  0x63   : > { %2292 = vmatmul.msk.f32.gmra.mxu2 %vm665_vm1, %v935_v0  ;;  %2296 = vmatmul.msk.f32.gmra.mxu3 %vm665_vm1, %v935_v0 }
  0x64   : > { %1060 = vmatpush.msra.mxu0 %v2315_v53  ;;  %1089 = vmatpush.msra.mxu1 %v2316_v1 }
  0x66   : > { %1061 = vmatpush.msra.mxu0 %v2313_v5  ;;  %1090 = vmatpush.msra.mxu1 %v2314_v6 }
  0x68   : > { %1062 = vmatpush.msra.mxu0 %v2311_v9  ;;  %1091 = vmatpush.msra.mxu1 %v2312_v10 }
  0x6a   : > { %2261 = vmatmul.msk.f32.gmra.mxu0 %vm665_vm1, %v830_v11  ;;  %2265 = vmatmul.msk.f32.gmra.mxu1 %vm665_vm1, %v830_v11 }
  0x6b   : > { %2293 = vmatmul.msk.f32.gmra.mxu2 %vm665_vm1, %v937_v12  ;;  %2297 = vmatmul.msk.f32.gmra.mxu3 %vm665_vm1, %v937_v12 }
  0x6c   : > { %1063 = vmatpush.msra.mxu0 %v2309_v4  ;;  %1092 = vmatpush.msra.mxu1 %v2310_v13 }
  0x6e   : > { %1064 = vmatpush.msra.mxu0 %v2307_v14  ;;  %1093 = vmatpush.msra.mxu1 %v2308_v15  ;;  %v1213_v14 = vld [vmem:[%s4069_s4 + $0x58] sm:$0xff] }
  0x70   : > { %1065 = vmatpush.msra.mxu0 %v2305_v16  ;;  %1094 = vmatpush.msra.mxu1 %v2306_v17 }
  0x72   : > { %2262 = vmatmul.msk.f32.gmra.mxu0 %vm665_vm1, %v829_v3  ;;  %2266 = vmatmul.msk.f32.gmra.mxu1 %vm665_vm1, %v829_v3  ;;  %v1214_v3 = vld [vmem:[%s4069_s4 + $0x60] sm:$0xff] }
  0x73   : > { %2294 = vmatmul.msk.f32.gmra.mxu2 %vm665_vm1, %v936_v7  ;;  %2298 = vmatmul.msk.f32.gmra.mxu3 %vm665_vm1, %v936_v7 }
  0x74   : > { %1066 = vmatpush.msra.mxu0 %v2303_v18  ;;  %1095 = vmatpush.msra.mxu1 %v2304_v19  ;;  %v1119_v19 = vld [vmem:[%s4070_s24] sm:$0x3] }
  0x76   : > { %1067 = vmatpush.msra.mxu0 %v2301_v20  ;;  %1096 = vmatpush.msra.mxu1 %v2302_v21 }
  0x78   : > { %1068 = vmatpush.msra.mxu0 %v2299_v22  ;;  %1097 = vmatpush.msra.mxu1 %v2300_v23 }
  0x7a   : > { %2323 = vmatmul.msk.f32.vlgmr.msra.gmra.mxu0 %vm665_vm1, %v3111_v56  ;;  %2327 = vmatmul.msk.f32.vlgmr.msra.gmra.mxu1 %vm665_vm1, %v3111_v56 }
  0x7b   : > { %1230 = vmatpush.msrb.mxu0 %v1217_v59 }
  0x82   : > { %2324 = vmatmul.msk.f32.gmra.mxu0 %vm665_vm1, %v3125_v60  ;;  %2328 = vmatmul.msk.f32.gmra.mxu1 %vm665_vm1, %v3125_v60  ;;  %v1216_v60 = vld [vmem:[%s4069_s4 + $0x70] sm:$0xff] }
  0x83   : > { %1231 = vmatpush.msrb.mxu0 %v1216_v60  ;;  %v1207_v60 = vld [vmem:[%s4069_s4 + $0x28] sm:$0xff] }
  0x85   : > { %1232 = vmatpush.msrb.mxu0 %v1215_v63  ;;  %v1141_v63 = vld [vmem:[%s4071_s0] sm:$0xff] }
  0x87   : > { %1233 = vmatpush.msrb.mxu0 %v1214_v3  ;;  %v1219_v3 = vld [vmem:[%s4069_s4 + $0x88] sm:$0xff] }
  0x89   : > { %1234 = vmatpush.msrb.mxu0 %v1213_v14  ;;  %v1292_v14 = vld [vmem:[%s4073_s5 + $0x80] sm:$0xff] }
  0x8a   : > { %2325 = vmatmul.msk.f32.gmra.mxu0 %vm665_vm1, %v1044_v8  ;;  %2329 = vmatmul.msk.f32.gmra.mxu1 %vm665_vm1, %v1044_v8 }
  0x92   : > { %2326 = vmatmul.msk.f32.gmra.mxu0 %vm665_vm1, %v1043_v2  ;;  %2330 = vmatmul.msk.f32.gmra.mxu1 %vm665_vm1, %v1043_v2 }
  0xb7   : > { %v691_v24 = vpop.f32.mrf.mxu0  ;;  %v720_v25 = vpop.f32.mrf.mxu1 }
  0xbe   : > { %v757_v28 = vpop.f32.mrf.mxu2  ;;  %v786_v29 = vpop.f32.mrf.mxu3 }
  0xbf   : > { %v694_v26 = vpop.f32.mrf.mxu0  ;;  %v723_v27 = vpop.f32.mrf.mxu1  ;;  %v758_v9 = vadd.f32 %v757_v28, %v691_v24  ;;  %v787_v10 = vadd.f32 %v786_v29, %v720_v25  ;;  %v1212_v24 = vld [vmem:[%s4069_s4 + $0x50] sm:$0xff] }
  0xc0   : > { %1235 = vmatpush.msrb.mxu0 %v1212_v24  ;;  %v1288_v24 = vld [vmem:[%s4073_s5 + $0x60] sm:$0xff] }
  0xc6   : > { %v760_v32 = vpop.f32.mrf.mxu2  ;;  %v789_v33 = vpop.f32.mrf.mxu3 }
  0xc7   : > { %v697_v30 = vpop.f32.mrf.mxu0  ;;  %v726_v31 = vpop.f32.mrf.mxu1  ;;  %v761_v1 = vadd.f32 %v760_v32, %v694_v26  ;;  %v790_v2 = vadd.f32 %v789_v33, %v723_v27  ;;  %v1122_v32 = vperm.slane %v1119_v19, 1 }
  0xce   : > { %v763_v40 = vpop.f32.mrf.mxu2  ;;  %v792_v41 = vpop.f32.mrf.mxu3 }
  0xcf   : > { %v700_v34 = vpop.f32.mrf.mxu0  ;;  %v729_v35 = vpop.f32.mrf.mxu1  ;;  %v764_v0 = vadd.f32 %v763_v40, %v697_v30  ;;  %v793_v53 = vadd.f32 %v792_v41, %v726_v31  ;;  %v1121_v31 = vperm.slane %v1119_v19, 0  ;;  %v1290_v19 = vld [vmem:[%s4073_s5 + $0x70] sm:$0xff] }
  0xd6   : > { %v766_v44 = vpop.f32.mrf.mxu2  ;;  %v795_v45 = vpop.f32.mrf.mxu3 }
  0xd7   : > { %v856_v36 = vpop.f32.mrf.mxu0  ;;  %v885_v37 = vpop.f32.mrf.mxu1  ;;  %v767_v5 = vadd.f32 %v766_v44, %v700_v34  ;;  %v796_v6 = vadd.f32 %v795_v45, %v729_v35  ;;  %v1211_v35 = vld [vmem:[%s4069_s4 + $0x48] sm:$0xff]  ;;  %v1210_v44 = vld [vmem:[%s4069_s4 + $0x40] sm:$0xff] }
  0xd8   : > { %v897_v20 = vadd.f32 %v856_v36, %v758_v9  ;;  %v898_v21 = vadd.f32 %v885_v37, %v787_v10  ;;  %1236 = vmatpush.msrb.mxu0 %v1211_v35  ;;  %v1203_v9 = vld [vmem:[%s4069_s4 + $0x8] sm:$0xff]  ;;  %v1202_v10 = vld [vmem:[%s4069_s4] sm:$0xff]  ;;  %v2348_v35 = vld [vmem:[%s4073_s5 + $0xf8] sm:$0xff] }
  0xda   : > { %1237 = vmatpush.msrb.mxu0 %v1210_v44  ;;  %v2344_v44 = vld [vmem:[%s4073_s5 + $0xd8] sm:$0xff] }
  0xde   : > { %v963_v48 = vpop.f32.mrf.mxu2  ;;  %v992_v49 = vpop.f32.mrf.mxu3 }
  0xdf   : > { %v859_v42 = vpop.f32.mrf.mxu0  ;;  %v888_v43 = vpop.f32.mrf.mxu1  ;;  %v1004_v29 = vadd.f32 %v963_v48, %v897_v20  ;;  %v1005_v30 = vadd.f32 %v992_v49, %v898_v21  ;;  %v2393_v20 = vld [vmem:[%s4073_s5 + $0x200] sm:$0xf] }
  0xe0   : > { %v899_v11 = vadd.f32 %v859_v42, %v761_v1  ;;  %v900_v12 = vadd.f32 %v888_v43, %v790_v2  ;;  %v1221_v1 = vld [vmem:[%s4069_s4 + $0x98] sm:$0xff]  ;;  %v1220_v2 = vld [vmem:[%s4069_s4 + $0x90] sm:$0xff]  ;;  %v2353_v21 = vld [vmem:[%s4073_s5 + $0x120] sm:$0xff] }
  0xe6   : > { %v966_v52 = vpop.f32.mrf.mxu2  ;;  %v995_v54 = vpop.f32.mrf.mxu3 }
  0xe7   : > { %v862_v46 = vpop.f32.mrf.mxu0  ;;  %v891_v47 = vpop.f32.mrf.mxu1  ;;  %v1006_v22 = vadd.f32 %v966_v52, %v899_v11  ;;  %v1007_v23 = vadd.f32 %v995_v54, %v900_v12  ;;  %v1209_v54 = vld [vmem:[%s4069_s4 + $0x38] sm:$0xff]  ;;  %v1296_v11 = vld [vmem:[%s4073_s5 + $0xa0] sm:$0xf]  ;;  %v1294_v12 = vld [vmem:[%s4073_s5 + $0x90] sm:$0xff] }
  0xe8   : > { %v901_v7 = vadd.f32 %v862_v46, %v764_v0  ;;  %v902_v8 = vadd.f32 %v891_v47, %v793_v53  ;;  %1238 = vmatpush.msrb.mxu0 %v1209_v54  ;;  %v1222_v0 = vld [vmem:[%s4069_s4 + $0xa0] sm:$0xff] }
  0xe9   : > { %v1206_v53 = vld [vmem:[%s4069_s4 + $0x20] sm:$0xff] }
  0xea   : > { %v2419_v54 = vld [vmem:[%s4073_s5 + $0x2a0] sm:$0xff] }
  0xee   : > { %v969_v57 = vpop.f32.mrf.mxu2  ;;  %v998_v58 = vpop.f32.mrf.mxu3 }
  0xef   : > { %v865_v50 = vpop.f32.mrf.mxu0  ;;  %v894_v51 = vpop.f32.mrf.mxu1  ;;  %v1008_v15 = vadd.f32 %v969_v57, %v901_v7  ;;  %v1009_v16 = vadd.f32 %v998_v58, %v902_v8  ;;  %v1208_v57 = vld [vmem:[%s4069_s4 + $0x30] sm:$0xff]  ;;  %v1218_v7 = vld [vmem:[%s4069_s4 + $0x80] sm:$0xff] }
  0xf0   : > { %v903_v17 = vadd.f32 %v865_v50, %v767_v5  ;;  %v904_v18 = vadd.f32 %v894_v51, %v796_v6  ;;  %1239 = vmatpush.msrb.mxu0 %v1208_v57  ;;  %v1142_v5 = vld [vmem:[%s4072_s26 + $0x8] sm:$0x3f]  ;;  %v1205_v6 = vld [vmem:[%s4069_s4 + $0x18] sm:$0xff]  ;;  %v1204_v8 = vld [vmem:[%s4069_s4 + $0x10] sm:$0xff] }
  0xf1   : > { %v2339_v57 = vld [vmem:[%s4073_s5 + $0xb0] sm:$0xff] }
  0xf2   : > { %1240 = vmatpush.msrb.mxu0 %v1207_v60  ;;  %v2377_v60 = vld [vmem:[%s4073_s5 + $0x180] sm:$0xff] }
  0xf4   : > { %1241 = vmatpush.msrb.mxu0 %v1206_v53  ;;  %v2392_v53 = vld [vmem:[%s4073_s5 + $0x1f8] sm:$0xff] }
  0xf6   : > { %v972_v4 = vpop.f32.mrf.mxu2  ;;  %v1001_v13 = vpop.f32.mrf.mxu3  ;;  %1242 = vmatpush.msrb.mxu0 %v1205_v6  ;;  %v2411_v6 = vld [vmem:[%s4073_s5 + $0x260] sm:$0xff] }
  0xf7   : > { %v1070_v55 = vpop.f32.mrf.mxu0  ;;  %v1099_v56 = vpop.f32.mrf.mxu1  ;;  %v1010_v25 = vadd.f32 %v972_v4, %v903_v17  ;;  %v1011_v26 = vadd.f32 %v1001_v13, %v904_v18  ;;  %v2359_v4 = vld [vmem:[%s4073_s5 + $0x150] sm:$0xf]  ;;  %v2360_v13 = vld [vmem:[%s4073_s5 + $0x158] sm:$0xf] }
  0xf8   : > { %v1111_v42 = vadd.f32 %v1070_v55, %v1004_v29  ;;  %v1112_v43 = vadd.f32 %v1099_v56, %v1005_v30  ;;  %1243 = vmatpush.msrb.mxu0 %v1204_v8  ;;  %2364 = vmatpush.msk.msrb.mxu1 %vm1037_vm4, %v2360_v13  ;;  %v2355_v17 = vld [vmem:[%s4073_s5 + $0x130] sm:$0xff]  ;;  %v2356_v18 = vld [vmem:[%s4073_s5 + $0x138] sm:$0xff]  ;;  %v2349_v30 = vld [vmem:[%s4073_s5 + $0x100] sm:$0xff] }
  0xf9   : > { %v2387_v29 = vld [vmem:[%s4073_s5 + $0x1d0] sm:$0xff]  ;;  %v1291_v8 = vld [vmem:[%s4073_s5 + $0x78] sm:$0xff]  ;;  %v2407_v13 = vld [vmem:[%s4073_s5 + $0x240] sm:$0xff] }
  0xfa   : > { %v1125_v55 = vadd.f32 %v1121_v31, %v1111_v42  ;;  %v1126_v56 = vadd.f32 %v1122_v32, %v1112_v43  ;;  %1244 = vmatpush.msrb.mxu0 %v1203_v9  ;;  %v1280_v42 = vld [vmem:[%s4073_s5 + $0x20] sm:$0xff]  ;;  %v2343_v43 = vld [vmem:[%s4073_s5 + $0xd0] sm:$0xff]  ;;  %v2388_v9 = vld [vmem:[%s4073_s5 + $0x1d8] sm:$0xff] }
  0xfc   : > { %1245 = vmatpush.msrb.mxu0 %v1202_v10  ;;  %v2409_v10 = vld [vmem:[%s4073_s5 + $0x250] sm:$0xff] }
  0xfe   : > { %2395 = vmatpush.msk.msra.mxu0 %vm1037_vm4, %v2393_v20  ;;  %v2382_v20 = vld [vmem:[%s4073_s5 + $0x1a8] sm:$0xff] }
  0xff   : > { %v1073_v38 = vpop.f32.mrf.mxu0  ;;  %v1102_v39 = vpop.f32.mrf.mxu1 }
 0x100   : > { %v1113_v36 = vadd.f32 %v1073_v38, %v1006_v22  ;;  %v1114_v37 = vadd.f32 %v1102_v39, %v1007_v23  ;;  %v2354_v22 = vld [vmem:[%s4073_s5 + $0x128] sm:$0xff]  ;;  %v2391_v23 = vld [vmem:[%s4073_s5 + $0x1f0] sm:$0xff] }
 0x101   : > { %1481 = vmatpush.msra.mxu0 %v2391_v23  ;;  %v1283_v23 = vld [vmem:[%s4073_s5 + $0x38] sm:$0xff] }
 0x102   : > { %v1127_v49 = vadd.f32 %v1121_v31, %v1113_v36  ;;  %v1128_v50 = vadd.f32 %v1122_v32, %v1114_v37  ;;  %v1282_v36 = vld [vmem:[%s4073_s5 + $0x30] sm:$0xff] }
 0x103   : > { %v2383_v37 = vld [vmem:[%s4073_s5 + $0x1b0] sm:$0xff] }
 0x104   : > { %v1135_v58 = vmax.f32 %v1127_v49, 0.0  ;;  %v1136_v59 = vmax.f32 %v1128_v50, 0.0 }
 0x107   : > { %v1076_v61 = vpop.f32.mrf.mxu0  ;;  %v1105_v62 = vpop.f32.mrf.mxu1 }
 0x108   : > { %v1115_v27 = vadd.f32 %v1076_v61, %v1008_v15  ;;  %v1116_v28 = vadd.f32 %v1105_v62, %v1009_v16  ;;  %v1133_v61 = vmax.f32 %v1125_v55, 0.0  ;;  %v1134_v62 = vmax.f32 %v1126_v56, 0.0  ;;  %v2357_v15 = vld [vmem:[%s4073_s5 + $0x140] sm:$0xff]  ;;  %v2358_v16 = vld [vmem:[%s4073_s5 + $0x148] sm:$0xff] }
 0x109   : > { %1366 = vmatpush.msrb.mxu1 %v2358_v16  ;;  %v2341_v55 = vld [vmem:[%s4073_s5 + $0xc0] sm:$0xff]  ;;  %v2342_v56 = vld [vmem:[%s4073_s5 + $0xc8] sm:$0xff]  ;;  %v2384_v16 = vld [vmem:[%s4073_s5 + $0x1b8] sm:$0xff] }
 0x10a   : > { %v1129_v45 = vadd.f32 %v1121_v31, %v1115_v27  ;;  %v1130_v46 = vadd.f32 %v1122_v32, %v1116_v28  ;;  %v2352_v27 = vld [vmem:[%s4073_s5 + $0x118] sm:$0xff]  ;;  %v1286_v28 = vld [vmem:[%s4073_s5 + $0x50] sm:$0xff] }
 0x10b   : > { %1367 = vmatpush.msrb.mxu1 %v2356_v18  ;;  %v2443_v18 = vld [vmem:[%s4073_s5 + $0x330] sm:$0xff] }
 0x10c   : > { %v1137_v38 = vmax.f32 %v1129_v45, 0.0  ;;  %v1138_v39 = vmax.f32 %v1130_v46, 0.0  ;;  %v1278_v45 = vld [vmem:[%s4073_s5 + $0x10] sm:$0xff]  ;;  %v1276_v46 = vld [vmem:[%s4073_s5] sm:$0xff] }
 0x10d   : > { %1368 = vmatpush.msrb.mxu1 %v2354_v22  ;;  %v2441_v22 = vld [vmem:[%s4073_s5 + $0x320] sm:$0xff] }
 0x10f   : > { %v1079_v33 = vpop.f32.mrf.mxu0  ;;  %v1108_v34 = vpop.f32.mrf.mxu1  ;;  %1369 = vmatpush.msrb.mxu1 %v2352_v27  ;;  %v1281_v27 = vld [vmem:[%s4073_s5 + $0x28] sm:$0xff] }
 0x110   : > { %v1117_v40 = vadd.f32 %v1079_v33, %v1010_v25  ;;  %v1118_v41 = vadd.f32 %v1108_v34, %v1011_v26  ;;  %v2389_v25 = vld [vmem:[%s4073_s5 + $0x1e0] sm:$0xff]  ;;  %v2351_v26 = vld [vmem:[%s4073_s5 + $0x110] sm:$0xff] }
 0x111   : > { %1482 = vmatpush.msra.mxu0 %v2389_v25  ;;  %v2385_v33 = vld [vmem:[%s4073_s5 + $0x1c0] sm:$0xff]  ;;  %v2347_v34 = vld [vmem:[%s4073_s5 + $0xf0] sm:$0xff] }
 0x112   : > { %v1131_v47 = vadd.f32 %v1121_v31, %v1117_v40  ;;  %v1132_v48 = vadd.f32 %v1122_v32, %v1118_v41  ;;  %v2350_v31 = vld [vmem:[%s4073_s5 + $0x108] sm:$0xff]  ;;  %v1284_v32 = vld [vmem:[%s4073_s5 + $0x40] sm:$0xff]  ;;  %v2401_v25 = vld [vmem:[%s4073_s5 + $0x210] sm:$0xff] }
 0x113   : > { %1483 = vmatpush.msra.mxu0 %v2387_v29  ;;  %1370 = vmatpush.msrb.mxu1 %v2350_v31  ;;  %v2345_v40 = vld [vmem:[%s4073_s5 + $0xe0] sm:$0xff]  ;;  %v2346_v41 = vld [vmem:[%s4073_s5 + $0xe8] sm:$0xff]  ;;  %v2376_v31 = vld [vmem:[%s4073_s5 + $0x178] sm:$0xff] }
 0x114   : > { %v1139_v51 = vmax.f32 %v1131_v47, 0.0  ;;  %v1140_v52 = vmax.f32 %v1132_v48, 0.0  ;;  %v2421_v47 = vld [vmem:[%s4073_s5 + $0x2b0] sm:$0xf]  ;;  %v2437_v29 = vld [vmem:[%s4073_s5 + $0x300] sm:$0xff] }
 0x115   : > { %1484 = vmatpush.msra.mxu0 %v2385_v33  ;;  %1371 = vmatpush.msrb.mxu1 %v2348_v35  ;;  %v1277_v33 = vld [vmem:[%s4073_s5 + $0x8] sm:$0xff]  ;;  %v2433_v35 = vld [vmem:[%s4073_s5 + $0x2e0] sm:$0xff] }
 0x116   : > { %2331 = vmatpush.msk.msra.mxu2 %vm1037_vm4, %v1139_v51  ;;  %2334 = vmatpush.msk.msra.mxu3 %vm1037_vm4, %v1140_v52  ;;  %v2381_v52 = vld [vmem:[%s4073_s5 + $0x1a0] sm:$0xff] }
 0x117   : > { %1485 = vmatpush.msra.mxu0 %v2383_v37  ;;  %1372 = vmatpush.msrb.mxu1 %v2346_v41 }
 0x118   : > { %1169 = vmatpush.msra.mxu2 %v1137_v38  ;;  %1192 = vmatpush.msra.mxu3 %v1138_v39  ;;  %v2379_v38 = vld [vmem:[%s4073_s5 + $0x190] sm:$0xff] }
 0x119   : > { %1373 = vmatpush.msrb.mxu1 %v2344_v44  ;;  %1486 = vmatpush.msra.mxu0 %v2381_v52  ;;  %v2417_v39 = vld [vmem:[%s4073_s5 + $0x290] sm:$0xff] }
 0x11a   : > { %1170 = vmatpush.msra.mxu2 %v1135_v58  ;;  %1193 = vmatpush.msra.mxu3 %v1136_v59  ;;  %v2340_v58 = vld [vmem:[%s4073_s5 + $0xb8] sm:$0xff]  ;;  %v1297_v59 = vld [vmem:[%s4073_s5 + $0xa8] sm:$0xf] }
 0x11b   : > { %1374 = vmatpush.msrb.mxu1 %v2342_v56  ;;  %1487 = vmatpush.msra.mxu0 %v2379_v38  ;;  %v2420_v56 = vld [vmem:[%s4073_s5 + $0x2a8] sm:$0xff]  ;;  %v2448_v38 = vld [vmem:[%s4073_s5 + $0x358] sm:$0xff] }
 0x11c   : > { %1171 = vmatpush.msra.mxu2 %v1133_v61  ;;  %1194 = vmatpush.msra.mxu3 %v1134_v62  ;;  %v2394_v61 = vld [vmem:[%s4073_s5 + $0x208] sm:$0xf]  ;;  %v2415_v62 = vld [vmem:[%s4073_s5 + $0x280] sm:$0xff] }
 0x11d   : > { %2335 = vmatmul.msk.f32.vlgmr.msra.gmra.mxu3 %vm1143_vm5, %v1141_v63  ;;  %2332 = vmatmul.msk.f32.vlgmr.msra.gmra.mxu2 %vm1143_vm5, %v1141_v63  ;;  %v1295_v63 = vld [vmem:[%s4073_s5 + $0x98] sm:$0xff] }
 0x11e   : > { %1264 = vmatpush.msrb.mxu2 %v1222_v0  ;;  %2361 = vmatpush.msk.msrb.mxu3 %vm1037_vm4, %v2359_v4  ;;  %v2375_v0 = vld [vmem:[%s4073_s5 + $0x170] sm:$0xff]  ;;  %v2386_v4 = vld [vmem:[%s4073_s5 + $0x1c8] sm:$0xff] }
 0x11f   : > { %1375 = vmatpush.msrb.mxu1 %v2340_v58  ;;  %1488 = vmatpush.msra.mxu0 %v2377_v60  ;;  %v2446_v58 = vld [vmem:[%s4073_s5 + $0x348] sm:$0xff] }
 0x120   : > { %1265 = vmatpush.msrb.mxu2 %v1221_v1  ;;  %1343 = vmatpush.msrb.mxu3 %v2357_v15  ;;  %v2413_v1 = vld [vmem:[%s4073_s5 + $0x270] sm:$0xff]  ;;  %v1287_v15 = vld [vmem:[%s4073_s5 + $0x58] sm:$0xff]  ;;  %v2416_v60 = vld [vmem:[%s4073_s5 + $0x288] sm:$0xff] }
 0x121   : > { %2398 = vmatpush.msk.msra.mxu1 %vm1037_vm4, %v2394_v61  ;;  %1489 = vmatpush.msra.mxu0 %v2375_v0  ;;  %v2444_v61 = vld [vmem:[%s4073_s5 + $0x338] sm:$0xff]  ;;  %v2412_v0 = vld [vmem:[%s4073_s5 + $0x268] sm:$0xff] }
 0x122   : > { %1266 = vmatpush.msrb.mxu2 %v1220_v2  ;;  %1344 = vmatpush.msrb.mxu3 %v2355_v17  ;;  %v1293_v2 = vld [vmem:[%s4073_s5 + $0x88] sm:$0xff]  ;;  %v2405_v17 = vld [vmem:[%s4073_s5 + $0x230] sm:$0xff] }
 0x123   : > { %1504 = vmatpush.msra.mxu1 %v2392_v53  ;;  %v2440_v53 = vld [vmem:[%s4073_s5 + $0x318] sm:$0xff] }
 0x124   : > { %1267 = vmatpush.msrb.mxu2 %v1219_v3  ;;  %1345 = vmatpush.msrb.mxu3 %v2353_v21  ;;  %v2373_v3 = vld [vmem:[%s4073_s5 + $0x160] sm:$0xff] }
 0x125   : > { %2336 = vmatmul.msk.f32.gmra.mxu3 %vm1143_vm5, %v1142_v5  ;;  %2333 = vmatmul.msk.f32.gmra.mxu2 %vm1143_vm5, %v1142_v5  ;;  %v2390_v5 = vld [vmem:[%s4073_s5 + $0x1e8] sm:$0xff]  ;;  %v2403_v21 = vld [vmem:[%s4073_s5 + $0x220] sm:$0xff] }
 0x126   : > { %1268 = vmatpush.msrb.mxu2 %v1218_v7  ;;  %1346 = vmatpush.msrb.mxu3 %v2351_v26  ;;  %v2449_v7 = vld [vmem:[%s4073_s5 + $0x360] sm:$0xf]  ;;  %v2439_v26 = vld [vmem:[%s4073_s5 + $0x310] sm:$0xff] }
 0x127   : > { %1490 = vmatpush.msra.mxu0 %v2373_v3  ;;  %1505 = vmatpush.msra.mxu1 %v2390_v5  ;;  %v2438_v3 = vld [vmem:[%s4073_s5 + $0x308] sm:$0xff] }
 0x128   : > { %2367 = vmatpush.msk.msra.mxu2 %vm1037_vm4, %v1296_v11  ;;  %1347 = vmatpush.msrb.mxu3 %v2349_v30  ;;  %v2447_v11 = vld [vmem:[%s4073_s5 + $0x350] sm:$0xff]  ;;  %v1279_v30 = vld [vmem:[%s4073_s5 + $0x18] sm:$0xff] }
 0x129   : > { %1506 = vmatpush.msra.mxu1 %v2388_v9  ;;  %v2406_v9 = vld [vmem:[%s4073_s5 + $0x238] sm:$0xff] }
 0x12a   : > { %1399 = vmatpush.msra.mxu2 %v1294_v12  ;;  %1348 = vmatpush.msrb.mxu3 %v2347_v34  ;;  %v1289_v12 = vld [vmem:[%s4073_s5 + $0x68] sm:$0xff] }
 0x12b   : > { %1507 = vmatpush.msra.mxu1 %v2386_v4  ;;  %v2374_v34 = vld [vmem:[%s4073_s5 + $0x168] sm:$0xff]  ;;  %v2402_v4 = vld [vmem:[%s4073_s5 + $0x218] sm:$0xff] }
 0x12c   : > { %1400 = vmatpush.msra.mxu2 %v1292_v14  ;;  %1349 = vmatpush.msrb.mxu3 %v2345_v40  ;;  %v2445_v14 = vld [vmem:[%s4073_s5 + $0x340] sm:$0xff] }
 0x12d   : > { %1508 = vmatpush.msra.mxu1 %v2384_v16  ;;  %v2429_v40 = vld [vmem:[%s4073_s5 + $0x2c0] sm:$0xff] }
 0x12e   : > { %1401 = vmatpush.msra.mxu2 %v1290_v19  ;;  %1350 = vmatpush.msrb.mxu3 %v2343_v43  ;;  %v1285_v19 = vld [vmem:[%s4073_s5 + $0x48] sm:$0xff] }
 0x12f   : > { %1509 = vmatpush.msra.mxu1 %v2382_v20 }
 0x130   : > { %1402 = vmatpush.msra.mxu2 %v1288_v24  ;;  %1351 = vmatpush.msrb.mxu3 %v2341_v55  ;;  %v2380_v24 = vld [vmem:[%s4073_s5 + $0x198] sm:$0xff] }
 0x131   : > { %1510 = vmatpush.msra.mxu1 %v2380_v24 }
 0x132   : > { %1403 = vmatpush.msra.mxu2 %v1286_v28  ;;  %1352 = vmatpush.msrb.mxu3 %v2339_v57  ;;  %v2378_v28 = vld [vmem:[%s4073_s5 + $0x188] sm:$0xff]  ;;  %v2418_v57 = vld [vmem:[%s4073_s5 + $0x298] sm:$0xff] }
 0x133   : > { %1511 = vmatpush.msra.mxu1 %v2378_v28 }
 0x134   : > { %1404 = vmatpush.msra.mxu2 %v1284_v32  ;;  %2370 = vmatpush.msk.msra.mxu3 %vm1037_vm4, %v1297_v59  ;;  %v2435_v32 = vld [vmem:[%s4073_s5 + $0x2f0] sm:$0xff] }
 0x135   : > { %1512 = vmatpush.msra.mxu1 %v2376_v31 }
 0x136   : > { %1405 = vmatpush.msra.mxu2 %v1282_v36  ;;  %1422 = vmatpush.msra.mxu3 %v1295_v63  ;;  %v2431_v36 = vld [vmem:[%s4073_s5 + $0x2d0] sm:$0xff]  ;;  %v2442_v63 = vld [vmem:[%s4073_s5 + $0x328] sm:$0xff] }
 0x137   : > { %1513 = vmatpush.msra.mxu1 %v2374_v34 }
 0x138   : > { %1406 = vmatpush.msra.mxu2 %v1280_v42  ;;  %1423 = vmatpush.msra.mxu3 %v1293_v2 }
 0x13a   : > { %1407 = vmatpush.msra.mxu2 %v1278_v45  ;;  %1424 = vmatpush.msra.mxu3 %v1291_v8 }
 0x13c   : > { %1408 = vmatpush.msra.mxu2 %v1276_v46  ;;  %1425 = vmatpush.msra.mxu3 %v1289_v12  ;;  %v2432_v12 = vld [vmem:[%s4073_s5 + $0x2d8] sm:$0xff] }
 0x13e   : > { %1426 = vmatpush.msra.mxu3 %v1287_v15 }
 0x140   : > { %1427 = vmatpush.msra.mxu3 %v1285_v19 }
 0x142   : > { %1428 = vmatpush.msra.mxu3 %v1283_v23 }
 0x144   : > { %1429 = vmatpush.msra.mxu3 %v1281_v27 }
 0x146   : > { %1430 = vmatpush.msra.mxu3 %v1279_v30 }
 0x148   : > { %1431 = vmatpush.msra.mxu3 %v1277_v33 }
 0x1a0   : > { %v1196_v48 = vpop.f32.mrf.mxu3  ;;  %v1173_v49 = vpop.f32.mrf.mxu2 }
 0x1a1   : > { %2337 = vmatmul.msk.f32.vlgmr.msrb.gmra.mxu2 %vm1223_vm6, %v1196_v48  ;;  %1246 = vmatmul.f32.vlgmr.msrb.gmra.mxu0 %v1173_v49 }
 0x1a2   : > { %2423 = vmatpush.msk.msrb.mxu2 %vm1037_vm4, %v2421_v47  ;;  %2451 = vmatpush.msk.msrb.mxu0 %vm1037_vm4, %v2449_v7  ;;  %v2436_v7 = vld [vmem:[%s4073_s5 + $0x2f8] sm:$0xff] }
 0x1a4   : > { %1567 = vmatpush.msrb.mxu2 %v2419_v54  ;;  %1653 = vmatpush.msrb.mxu0 %v2447_v11  ;;  %v2450_v54 = vld [vmem:[%s4073_s5 + $0x368] sm:$0xf] }
 0x1a5   : > { %v2404_v11 = vld [vmem:[%s4073_s5 + $0x228] sm:$0xff] }
 0x1a6   : > { %1568 = vmatpush.msrb.mxu2 %v2417_v39  ;;  %1654 = vmatpush.msrb.mxu0 %v2445_v14 }
 0x1a8   : > { %v1199_v50 = vpop.f32.mrf.mxu3  ;;  %v1176_v51 = vpop.f32.mrf.mxu2  ;;  %1569 = vmatpush.msrb.mxu2 %v2415_v62  ;;  %1655 = vmatpush.msrb.mxu0 %v2443_v18  ;;  %v2414_v62 = vld [vmem:[%s4073_s5 + $0x278] sm:$0xff] }
 0x1a9   : > { %2338 = vmatmul.msk.f32.gmra.mxu2 %vm1223_vm6, %v1199_v50  ;;  %1249 = vmatmul.f32.gmra.mxu0 %v1176_v51  ;;  %v2422_v50 = vld [vmem:[%s4073_s5 + $0x2b8] sm:$0xf] }
 0x1aa   : > { %1570 = vmatpush.msrb.mxu2 %v2413_v1  ;;  %1656 = vmatpush.msrb.mxu0 %v2441_v22  ;;  %v2410_v1 = vld [vmem:[%s4073_s5 + $0x258] sm:$0xff] }
 0x1ac   : > { %1571 = vmatpush.msrb.mxu2 %v2411_v6  ;;  %1657 = vmatpush.msrb.mxu0 %v2439_v26  ;;  %v2408_v6 = vld [vmem:[%s4073_s5 + $0x248] sm:$0xff] }
 0x1ae   : > { %1572 = vmatpush.msrb.mxu2 %v2409_v10  ;;  %1658 = vmatpush.msrb.mxu0 %v2437_v29  ;;  %v2434_v10 = vld [vmem:[%s4073_s5 + $0x2e8] sm:$0xff]  ;;  %v3677_v29 = vld [vmem:[%s4074_s6] sm:$0x3] }
 0x1af   : > { %v1699_v34 = vperm.slane %v3677_v29, 0 }
 0x1b0   : > { %1573 = vmatpush.msrb.mxu2 %v2407_v13  ;;  %1659 = vmatpush.msrb.mxu0 %v2435_v32  ;;  %v2430_v13 = vld [vmem:[%s4073_s5 + $0x2c8] sm:$0xff] }
 0x1b2   : > { %1574 = vmatpush.msrb.mxu2 %v2405_v17  ;;  %1660 = vmatpush.msrb.mxu0 %v2433_v35 }
 0x1b4   : > { %1575 = vmatpush.msrb.mxu2 %v2403_v21  ;;  %1661 = vmatpush.msrb.mxu0 %v2431_v36 }
 0x1b6   : > { %1576 = vmatpush.msrb.mxu2 %v2401_v25  ;;  %1662 = vmatpush.msrb.mxu0 %v2429_v40  ;;  %v1778_v40 = vld [vmem:[%s4027_s8 + $0x78] sm:$0xff] }
 0x21e   : > { %v1247_v37 = vpop.f32.mrf.mxu0 }
 0x224   : > { %v1270_v41 = vpop.f32.mrf.mxu2 }
 0x225   : > { %v1271_v42 = vadd.f32 %v1270_v41, %v1247_v37  ;;  %v1777_v41 = vld [vmem:[%s4027_s8 + $0x70] sm:$0xff] }
 0x226   : > { %v1250_v43 = vpop.f32.mrf.mxu0 }
 0x227   : > { %2368 = vmatmul.msk.f32.vlgmr.msra.gmra.mxu2 %vm1326_vm7, %v1271_v42  ;;  %v1323_v46 = vrot.slane %v1271_v42, 1  ;;  %v1462_v48 = vrot.slane %v1271_v42, 2  ;;  %v1548_v39 = vrot.slane %v1271_v42, 3  ;;  %v1634_v5 = vrot.slane %v1271_v42, 4 }
 0x22c   : > { %v1273_v44 = vpop.f32.mrf.mxu2 }
 0x22d   : > { %v3570_v45 = vadd.f32 %v1273_v44, %v1250_v43 }
 0x22f   : > { %2369 = vmatmul.msk.f32.gmra.mxu2 %vm1326_vm7, %v3570_v45  ;;  %v1324_v47 = vrot.slane %v3570_v45, 1  ;;  %v3576_v49 = vrot.slane %v3570_v45, 2  ;;  %v1549_v55 = vrot.slane %v3570_v45, 3  ;;  %v1635_v2 = vrot.slane %v3570_v45, 4 }
 0x231   : > { %v1325_v51 = vsel %vm657_vm0, %v1323_v46, %v1324_v47  ;;  %v1464_v52 = vsel %vm823_vm2, %v1462_v48, %v3576_v49  ;;  %v1550_v59 = vsel %vm930_vm3, %v1548_v39, %v1549_v55  ;;  %v1636_v8 = vsel %vm1037_vm4, %v1634_v5, %v1635_v2  ;;  %v1782_v46 = vld [vmem:[%s4027_s8 + $0x98] sm:$0xff] }
 0x232   : > { %2362 = vmatmul.msk.f32.vlgmr.msrb.gmra.mxu3 %vm1326_vm7, %v1325_v51  ;;  %2365 = vmatmul.msk.f32.vlgmr.msrb.gmra.mxu1 %vm1326_vm7, %v1325_v51  ;;  %v1780_v51 = vld [vmem:[%s4027_s8 + $0x88] sm:$0xff] }
 0x233   : > { %2396 = vmatmul.msk.f32.vlgmr.msra.gmra.mxu0 %vm1326_vm7, %v1464_v52  ;;  %2426 = vmatpush.msk.msrb.mxu3 %vm1037_vm4, %v2422_v50  ;;  %v1781_v50 = vld [vmem:[%s4027_s8 + $0x90] sm:$0xff] }
 0x234   : > { %2454 = vmatpush.msk.msrb.mxu1 %vm1037_vm4, %v2450_v54  ;;  %1787 = vmatpush.msra.mxu0 %v1778_v40  ;;  %v1774_v54 = vld [vmem:[%s4027_s8 + $0x58] sm:$0xff]  ;;  %v1829_v40 = vld [vmem:[%s4028_s9 + $0x10] sm:$0xff] }
 0x235   : > { %1590 = vmatpush.msrb.mxu3 %v2420_v56  ;;  %1819 = vmatpush.msra.mxu2 %v1782_v46  ;;  %v1773_v56 = vld [vmem:[%s4027_s8 + $0x50] sm:$0xff]  ;;  %v2464_v46 = vld [vmem:[%s4028_s9 + $0x60] sm:$0xff] }
 0x236   : > { %1676 = vmatpush.msrb.mxu1 %v2448_v38  ;;  %1788 = vmatpush.msra.mxu0 %v1777_v41  ;;  %v1772_v38 = vld [vmem:[%s4027_s8 + $0x48] sm:$0xff] }
 0x237   : > { %2424 = vmatmul.msk.f32.vlgmr.msrb.gmra.mxu2 %vm1326_vm7, %v1550_v59  ;;  %1591 = vmatpush.msrb.mxu3 %v2418_v57 }
 0x238   : > { %1677 = vmatpush.msrb.mxu1 %v2446_v58  ;;  %1820 = vmatpush.msra.mxu2 %v1781_v50  ;;  %v2474_v50 = vld [vmem:[%s4028_s9 + $0xa0] sm:$0xff] }
 0x239   : > { %1592 = vmatpush.msrb.mxu3 %v2416_v60  ;;  %v1770_v60 = vld [vmem:[%s4027_s8 + $0x38] sm:$0xff] }
 0x23a   : > { %2363 = vmatmul.msk.f32.gmra.mxu3 %vm1326_vm7, %v1324_v47  ;;  %2366 = vmatmul.msk.f32.gmra.mxu1 %vm1326_vm7, %v1324_v47 }
 0x23b   : > { %2397 = vmatmul.msk.f32.gmra.mxu0 %vm1326_vm7, %v3576_v49  ;;  %1678 = vmatpush.msrb.mxu1 %v2444_v61 }
 0x23c   : > { %1593 = vmatpush.msrb.mxu3 %v2414_v62  ;;  %1821 = vmatpush.msra.mxu2 %v1780_v51  ;;  %v2462_v51 = vld [vmem:[%s4028_s9 + $0x50] sm:$0xff] }
 0x23d   : > { %1679 = vmatpush.msrb.mxu1 %v2442_v63  ;;  %v1769_v63 = vld [vmem:[%s4027_s8 + $0x30] sm:$0xff] }
 0x23e   : > { %1594 = vmatpush.msrb.mxu3 %v2412_v0 }
 0x23f   : > { %2425 = vmatmul.msk.f32.gmra.mxu2 %vm1326_vm7, %v1549_v55  ;;  %1680 = vmatpush.msrb.mxu1 %v2440_v53  ;;  %v1768_v53 = vld [vmem:[%s4027_s8 + $0x28] sm:$0xff] }
 0x240   : > { %1595 = vmatpush.msrb.mxu3 %v2410_v1 }
 0x241   : > { %1681 = vmatpush.msrb.mxu1 %v2438_v3  ;;  %v1767_v3 = vld [vmem:[%s4027_s8 + $0x20] sm:$0xff] }
 0x242   : > { %2371 = vmatmul.msk.f32.vlgmr.msra.gmra.mxu3 %vm1326_vm7, %v1271_v42  ;;  %2399 = vmatmul.msk.f32.vlgmr.msra.gmra.mxu1 %vm1326_vm7, %v1464_v52 }
 0x243   : > { %2452 = vmatmul.msk.f32.vlgmr.msrb.gmra.mxu0 %vm1326_vm7, %v1636_v8  ;;  %1596 = vmatpush.msrb.mxu3 %v2408_v6 }
 0x244   : > { %1682 = vmatpush.msrb.mxu1 %v2436_v7  ;;  %v1700_v7 = vperm.slane %v3677_v29, 1  ;;  %v2480_v29 = vld [vmem:[%s4028_s9 + $0xd0] sm:$0xff] }
 0x245   : > { %1597 = vmatpush.msrb.mxu3 %v2406_v9 }
 0x246   : > { %1683 = vmatpush.msrb.mxu1 %v2434_v10 }
 0x247   : > { %1598 = vmatpush.msrb.mxu3 %v2404_v11 }
 0x248   : > { %1684 = vmatpush.msrb.mxu1 %v2432_v12 }
 0x249   : > { %1599 = vmatpush.msrb.mxu3 %v2402_v4 }
 0x24a   : > { %2372 = vmatmul.msk.f32.gmra.mxu3 %vm1326_vm7, %v3570_v45  ;;  %2400 = vmatmul.msk.f32.gmra.mxu1 %vm1326_vm7, %v3576_v49  ;;  %v1776_v45 = vld [vmem:[%s4027_s8 + $0x68] sm:$0xff]  ;;  %v1775_v49 = vld [vmem:[%s4027_s8 + $0x60] sm:$0xff] }
 0x24b   : > { %2453 = vmatmul.msk.f32.gmra.mxu0 %vm1326_vm7, %v1635_v2  ;;  %1685 = vmatpush.msrb.mxu1 %v2430_v13  ;;  %v1766_v13 = vld [vmem:[%s4027_s8 + $0x18] sm:$0xff] }
 0x24c   : > { %1789 = vmatpush.msra.mxu0 %v1776_v45  ;;  %v2476_v45 = vld [vmem:[%s4028_s9 + $0xb0] sm:$0xff] }
 0x24e   : > { %1790 = vmatpush.msra.mxu0 %v1775_v49  ;;  %v2463_v49 = vld [vmem:[%s4028_s9 + $0x58] sm:$0xff] }
 0x250   : > { %1791 = vmatpush.msra.mxu0 %v1774_v54 }
 0x252   : > { %2427 = vmatmul.msk.f32.vlgmr.msrb.gmra.mxu3 %vm1326_vm7, %v1550_v59  ;;  %2455 = vmatmul.msk.f32.vlgmr.msrb.gmra.mxu1 %vm1326_vm7, %v1636_v8  ;;  %v1771_v59 = vld [vmem:[%s4027_s8 + $0x40] sm:$0xff] }
 0x253   : > { %1792 = vmatpush.msra.mxu0 %v1773_v56 }
 0x255   : > { %1793 = vmatpush.msra.mxu0 %v1772_v38 }
 0x257   : > { %1794 = vmatpush.msra.mxu0 %v1771_v59  ;;  %v1973_v59 = vld [vmem:[%s4031_s12 + $0x40] sm:$0xff] }
 0x259   : > { %1795 = vmatpush.msra.mxu0 %v1770_v60  ;;  %v1972_v60 = vld [vmem:[%s4031_s12 + $0x38] sm:$0xff] }
 0x25a   : > { %2428 = vmatmul.msk.f32.gmra.mxu3 %vm1326_vm7, %v1549_v55  ;;  %2456 = vmatmul.msk.f32.gmra.mxu1 %vm1326_vm7, %v1635_v2  ;;  %v1711_v55 = vld [vmem:[%s4026_s7] sm:$0x1f] }
 0x25b   : > { %1796 = vmatpush.msra.mxu0 %v1769_v63  ;;  %v1969_v63 = vld [vmem:[%s4031_s12 + $0x20] sm:$0xff] }
 0x25d   : > { %1797 = vmatpush.msra.mxu0 %v1768_v53  ;;  %v1967_v53 = vld [vmem:[%s4031_s12 + $0x10] sm:$0xff] }
 0x25f   : > { %1798 = vmatpush.msra.mxu0 %v1767_v3 }
 0x261   : > { %1799 = vmatpush.msra.mxu0 %v1766_v13  ;;  %v2002_v13 = vld [vmem:[%s4032_s13 + $0x10] sm:$0xff] }
 0x2aa   : > { %v1410_v14 = vpop.f32.mrf.mxu2 }
 0x2af   : > { %v1377_v15 = vpop.f32.mrf.mxu1 }
 0x2b0   : > { %v1492_v16 = vpop.f32.mrf.mxu0 }
 0x2b2   : > { %v1413_v17 = vpop.f32.mrf.mxu2 }
 0x2b5   : > { %v1354_v18 = vpop.f32.mrf.mxu3 }
 0x2b6   : > { %v1411_v22 = vadd.f32 %v1410_v14, %v1354_v18  ;;  %v1779_v14 = vld [vmem:[%s4027_s8 + $0x80] sm:$0xff] }
 0x2b7   : > { %v1380_v19 = vpop.f32.mrf.mxu1  ;;  %1822 = vmatpush.msra.mxu2 %v1779_v14  ;;  %v1835_v18 = vld [vmem:[%s4028_s9 + $0x40] sm:$0xff]  ;;  %v2001_v14 = vld [vmem:[%s4032_s13 + $0x8] sm:$0xff] }
 0x2b8   : > { %v1495_v20 = vpop.f32.mrf.mxu0  ;;  %v1521_v26 = vadd.f32 %v1492_v16, %v1411_v22  ;;  %v1764_v16 = vld [vmem:[%s4027_s8 + $0x8] sm:$0xff]  ;;  %v1763_v22 = vld [vmem:[%s4027_s8] sm:$0xff] }
 0x2ba   : > { %v1578_v21 = vpop.f32.mrf.mxu2 }
 0x2bb   : > { %v1607_v31 = vadd.f32 %v1578_v21, %v1521_v26  ;;  %v2471_v21 = vld [vmem:[%s4028_s9 + $0x98] sm:$0xff] }
 0x2bc   : > { %v2481_v26 = vld [vmem:[%s4028_s9 + $0xd8] sm:$0xff] }
 0x2bd   : > { %v1357_v23 = vpop.f32.mrf.mxu3 }
 0x2be   : > { %v1414_v24 = vadd.f32 %v1413_v17, %v1357_v23  ;;  %v1836_v17 = vld [vmem:[%s4028_s9 + $0x48] sm:$0xff]  ;;  %v1834_v23 = vld [vmem:[%s4028_s9 + $0x38] sm:$0xff] }
 0x2bf   : > { %v1515_v27 = vpop.f32.mrf.mxu1 }
 0x2c0   : > { %v1664_v25 = vpop.f32.mrf.mxu0  ;;  %v1523_v28 = vadd.f32 %v1495_v20, %v1414_v24  ;;  %v2482_v20 = vld [vmem:[%s4028_s9 + $0xe0] sm:$0xff]  ;;  %v2470_v24 = vld [vmem:[%s4028_s9 + $0x90] sm:$0xff] }
 0x2c1   : > { %v1693_v33 = vadd.f32 %v1664_v25, %v1607_v31  ;;  %v2468_v31 = vld [vmem:[%s4028_s9 + $0x80] sm:$0xff] }
 0x2c2   : > { %v1581_v30 = vpop.f32.mrf.mxu2 }
 0x2c3   : > { %v1609_v35 = vadd.f32 %v1581_v30, %v1523_v28  ;;  %v1703_v42 = vadd.f32 %v1699_v34, %v1693_v33  ;;  %v2469_v28 = vld [vmem:[%s4028_s9 + $0x88] sm:$0xff]  ;;  %v1831_v33 = vld [vmem:[%s4028_s9 + $0x20] sm:$0xff] }
 0x2c4   : > { %v1832_v30 = vld [vmem:[%s4028_s9 + $0x28] sm:$0xff] }
 0x2c5   : > { %v1433_v32 = vpop.f32.mrf.mxu3  ;;  %v1707_v52 = vmax.f32 %v1703_v42, 0.0  ;;  %v2466_v42 = vld [vmem:[%s4028_s9 + $0x70] sm:$0xff] }
 0x2c6   : > { %v1434_v39 = vadd.f32 %v1433_v32, %v1377_v15  ;;  %v1765_v15 = vld [vmem:[%s4027_s8 + $0x10] sm:$0xff]  ;;  %v2479_v32 = vld [vmem:[%s4028_s9 + $0xc8] sm:$0xff] }
 0x2c7   : > { %v1518_v43 = vpop.f32.mrf.mxu1  ;;  %1800 = vmatpush.msra.mxu0 %v1765_v15 }
 0x2c8   : > { %v1667_v36 = vpop.f32.mrf.mxu0  ;;  %v1522_v62 = vadd.f32 %v1515_v27, %v1434_v39  ;;  %v1833_v27 = vld [vmem:[%s4028_s9 + $0x30] sm:$0xff]  ;;  %v1976_v39 = vld [vmem:[%s4031_s12 + $0x58] sm:$0xff] }
 0x2c9   : > { %v1695_v37 = vadd.f32 %v1667_v36, %v1609_v35  ;;  %1801 = vmatpush.msra.mxu0 %v1764_v16  ;;  %v2478_v35 = vld [vmem:[%s4028_s9 + $0xc0] sm:$0xff]  ;;  %v1830_v36 = vld [vmem:[%s4028_s9 + $0x18] sm:$0xff] }
 0x2ca   : > { %v2000_v16 = vld [vmem:[%s4032_s13] sm:$0xff] }
 0x2cb   : > { %v1705_v44 = vadd.f32 %v1699_v34, %v1695_v37  ;;  %1802 = vmatpush.msra.mxu0 %v1763_v22  ;;  %v2467_v34 = vld [vmem:[%s4028_s9 + $0x78] sm:$0xff]  ;;  %v2038_v22 = vld [vmem:[%s4034_s15 + $0x48] sm:$0xff] }
 0x2cc   : > { %v2477_v37 = vld [vmem:[%s4028_s9 + $0xb8] sm:$0xff] }
 0x2cd   : > { %v1709_v47 = vmax.f32 %v1705_v44, 0.0  ;;  %v1436_v48 = vpop.f32.mrf.mxu3  ;;  %v1828_v44 = vld [vmem:[%s4028_s9 + $0x8] sm:$0xff] }
 0x2ce   : > { %v1437_v61 = vadd.f32 %v1436_v48, %v1380_v19  ;;  %v2483_v19 = vld [vmem:[%s4028_s9 + $0xe8] sm:$0xff] }
 0x2cf   : > { %2457 = vmatpush.msk.msra.mxu1 %vm1716_vm8, %v1709_v47  ;;  %v1687_v57 = vpop.f32.mrf.mxu1  ;;  %1915 = vmatpush.msrb.mxu2 %v2483_v19  ;;  %v1827_v47 = vld [vmem:[%s4028_s9] sm:$0xff]  ;;  %v2475_v48 = vld [vmem:[%s4028_s9 + $0xa8] sm:$0xff] }
 0x2d0   : > { %v1524_v1 = vadd.f32 %v1518_v43, %v1437_v61  ;;  %v2465_v43 = vld [vmem:[%s4028_s9 + $0x68] sm:$0xff]  ;;  %v1971_v61 = vld [vmem:[%s4031_s12 + $0x30] sm:$0xff]  ;;  %v2041_v19 = vld [vmem:[%s4034_s15 + $0x60] sm:$0xff] }
 0x2d1   : > { %1738 = vmatpush.msra.mxu1 %v1707_v52  ;;  %1916 = vmatpush.msrb.mxu2 %v2482_v20  ;;  %v2040_v20 = vld [vmem:[%s4034_s15 + $0x58] sm:$0xff] }
 0x2d2   : > { %2458 = vmatmul.msk.f32.vlgmr.msra.gmra.mxu1 %vm1712_vm9, %v1711_v55 }
 0x2d3   : > { %1859 = vmatpush.msrb.mxu1 %v2471_v21  ;;  %1917 = vmatpush.msrb.mxu2 %v2481_v26  ;;  %v2039_v21 = vld [vmem:[%s4034_s15 + $0x50] sm:$0xff]  ;;  %v2034_v26 = vld [vmem:[%s4034_s15 + $0x28] sm:$0xff] }
 0x2d5   : > { %v1601_v58 = vpop.f32.mrf.mxu3  ;;  %1860 = vmatpush.msrb.mxu1 %v2470_v24  ;;  %1918 = vmatpush.msrb.mxu2 %v2480_v29  ;;  %v2036_v24 = vld [vmem:[%s4034_s15 + $0x38] sm:$0xff] }
 0x2d6   : > { %v1608_v0 = vadd.f32 %v1601_v58, %v1522_v62  ;;  %v1974_v58 = vld [vmem:[%s4031_s12 + $0x48] sm:$0xff] }
 0x2d7   : > { %v1690_v8 = vpop.f32.mrf.mxu1  ;;  %1861 = vmatpush.msrb.mxu1 %v2469_v28  ;;  %1919 = vmatpush.msrb.mxu2 %v2479_v32  ;;  %v1970_v62 = vld [vmem:[%s4031_s12 + $0x28] sm:$0xff]  ;;  %v2032_v28 = vld [vmem:[%s4034_s15 + $0x18] sm:$0xff]  ;;  %v2029_v32 = vld [vmem:[%s4034_s15] sm:$0xff] }
 0x2d8   : > { %v1694_v5 = vadd.f32 %v1687_v57, %v1608_v0  ;;  %v1975_v57 = vld [vmem:[%s4031_s12 + $0x50] sm:$0xff]  ;;  %v1968_v0 = vld [vmem:[%s4031_s12 + $0x18] sm:$0xff] }
 0x2d9   : > { %1862 = vmatpush.msrb.mxu1 %v2468_v31  ;;  %1920 = vmatpush.msrb.mxu2 %v2478_v35  ;;  %v2030_v31 = vld [vmem:[%s4034_s15 + $0x8] sm:$0xff]  ;;  %v2078_v35 = vld [vmem:[%s4036_s17 + $0x40] sm:$0xff] }
 0x2da   : > { %v1704_v11 = vadd.f32 %v1700_v7, %v1694_v5 }
 0x2db   : > { %1863 = vmatpush.msrb.mxu1 %v2467_v34  ;;  %1921 = vmatpush.msrb.mxu2 %v2477_v37  ;;  %v2079_v34 = vld [vmem:[%s4036_s17 + $0x48] sm:$0xff]  ;;  %v2076_v37 = vld [vmem:[%s4036_s17 + $0x30] sm:$0xff] }
 0x2dc   : > { %v1708_v4 = vmax.f32 %v1704_v11, 0.0  ;;  %v1936_v11 = vld [vmem:[%s4030_s11] sm:$0x1] }
 0x2dd   : > { %v1604_v2 = vpop.f32.mrf.mxu3  ;;  %1864 = vmatpush.msrb.mxu1 %v2466_v42  ;;  %1922 = vmatpush.msrb.mxu2 %v2476_v45  ;;  %v2073_v42 = vld [vmem:[%s4036_s17 + $0x18] sm:$0xff] }
 0x2de   : > { %v1610_v6 = vadd.f32 %v1604_v2, %v1524_v1  ;;  %v1966_v1 = vld [vmem:[%s4031_s12 + $0x8] sm:$0xff] }
 0x2df   : > { %1865 = vmatpush.msrb.mxu1 %v2465_v43  ;;  %1923 = vmatpush.msrb.mxu2 %v2475_v48  ;;  %v2004_v43 = vld [vmem:[%s4033_s14] sm:$0x1]  ;;  %v2071_v48 = vld [vmem:[%s4036_s17 + $0x8] sm:$0xff] }
 0x2e0   : > { %v1696_v9 = vadd.f32 %v1690_v8, %v1610_v6  ;;  %v2534_v6 = vld [vmem:[%s4029_s10] ss:$0 sm:$0xff] }
 0x2e1   : > { %1866 = vmatpush.msrb.mxu1 %v2464_v46  ;;  %1924 = vmatpush.msrb.mxu2 %v2474_v50  ;;  %v2044_v50 = vld [vmem:[%s4035_s16] sm:$0x1] }
 0x2e2   : > { %v1706_v10 = vadd.f32 %v1700_v7, %v1696_v9 }
 0x2e3   : > { %1867 = vmatpush.msrb.mxu1 %v2463_v49  ;;  %v2070_v49 = vld [vmem:[%s4036_s17] sm:$0xff] }
 0x2e4   : > { %v1710_v12 = vmax.f32 %v1706_v10, 0.0 }
 0x2e5   : > { %1868 = vmatpush.msrb.mxu1 %v2462_v51 }
 0x2e6   : > { %2459 = vmatpush.msk.msra.mxu3 %vm1716_vm8, %v1710_v12  ;;  %v1965_v12 = vld [vmem:[%s4031_s12] sm:$0xff] }
 0x2e8   : > { %1758 = vmatpush.msra.mxu3 %v1708_v4  ;;  %v2003_v4 = vld [vmem:[%s4032_s13 + $0x18] sm:$0xff] }
 0x2e9   : > { %2460 = vmatmul.msk.f32.vlgmr.msra.gmra.mxu3 %vm1712_vm9, %v1711_v55 }
 0x2ea   : > { %1881 = vmatpush.msrb.mxu3 %v1836_v17  ;;  %v2043_v17 = vld [vmem:[%s4034_s15 + $0x70] sm:$0xff] }
 0x2ec   : > { %1882 = vmatpush.msrb.mxu3 %v1835_v18  ;;  %v2042_v18 = vld [vmem:[%s4034_s15 + $0x68] sm:$0xff] }
 0x2ee   : > { %1883 = vmatpush.msrb.mxu3 %v1834_v23  ;;  %v2037_v23 = vld [vmem:[%s4034_s15 + $0x40] sm:$0xff] }
 0x2f0   : > { %1884 = vmatpush.msrb.mxu3 %v1833_v27  ;;  %v2033_v27 = vld [vmem:[%s4034_s15 + $0x20] sm:$0xff] }
 0x2f2   : > { %1885 = vmatpush.msrb.mxu3 %v1832_v30  ;;  %v2031_v30 = vld [vmem:[%s4034_s15 + $0x10] sm:$0xff] }
 0x2f4   : > { %1886 = vmatpush.msrb.mxu3 %v1831_v33  ;;  %v2080_v33 = vld [vmem:[%s4036_s17 + $0x50] sm:$0xf] }
 0x2f5   : > { %2490 = vmatpush.msk.msrb.mxu0 %vm1037_vm4, %v2080_v33 }
 0x2f6   : > { %1887 = vmatpush.msrb.mxu3 %v1830_v36  ;;  %v2077_v36 = vld [vmem:[%s4036_s17 + $0x38] sm:$0xff] }
 0x2f7   : > { %2094 = vmatpush.msrb.mxu0 %v2079_v34 }
 0x2f8   : > { %1888 = vmatpush.msrb.mxu3 %v1829_v40  ;;  %v2075_v40 = vld [vmem:[%s4036_s17 + $0x28] sm:$0xff] }
 0x2f9   : > { %2095 = vmatpush.msrb.mxu0 %v2078_v35 }
 0x2fa   : > { %1889 = vmatpush.msrb.mxu3 %v1828_v44 }
 0x2fb   : > { %2096 = vmatpush.msrb.mxu0 %v2077_v36 }
 0x2fc   : > { %1890 = vmatpush.msrb.mxu3 %v1827_v47  ;;  %v2072_v47 = vld [vmem:[%s4036_s17 + $0x10] sm:$0xff] }
 0x2fd   : > { %2097 = vmatpush.msrb.mxu0 %v2076_v37 }
 0x2fe   : > { %1984 = vmatpush.msra.mxu3 %v1976_v39 }
 0x2ff   : > { %2098 = vmatpush.msrb.mxu0 %v2075_v40 }
 0x300   : > { %1985 = vmatpush.msra.mxu3 %v1975_v57 }
 0x302   : > { %1986 = vmatpush.msra.mxu3 %v1974_v58 }
 0x304   : > { %1987 = vmatpush.msra.mxu3 %v1973_v59 }
 0x306   : > { %1988 = vmatpush.msra.mxu3 %v1972_v60 }
 0x308   : > { %1989 = vmatpush.msra.mxu3 %v1971_v61 }
 0x30a   : > { %1990 = vmatpush.msra.mxu3 %v1970_v62 }
 0x30c   : > { %1991 = vmatpush.msra.mxu3 %v1969_v63 }
 0x30e   : > { %1992 = vmatpush.msra.mxu3 %v1968_v0 }
 0x310   : > { %1993 = vmatpush.msra.mxu3 %v1967_v53 }
 0x312   : > { %1994 = vmatpush.msra.mxu3 %v1966_v1 }
 0x314   : > { %1995 = vmatpush.msra.mxu3 %v1965_v12 }
 0x34f   : > { %v1740_v25 = vpop.f32.mrf.mxu1 }
 0x350   : > { %1803 = vmatmul.f32.vlgmr.msra.gmra.mxu0 %v1740_v25  ;;  %v2035_v25 = vld [vmem:[%s4034_s15 + $0x30] sm:$0xff] }
 0x36c   : > { %v1760_v41 = vpop.f32.mrf.mxu3 }
 0x36d   : > { %2461 = vmatmul.msk.f32.vlgmr.msra.gmra.mxu2 %vm1783_vm10, %v1760_v41  ;;  %v2074_v41 = vld [vmem:[%s4036_s17 + $0x20] sm:$0xff] }
 0x36e   : > { %2050 = vmatpush.msra.mxu2 %v2043_v17  ;;  %2099 = vmatpush.msrb.mxu0 %v2074_v41 }
 0x370   : > { %2051 = vmatpush.msra.mxu2 %v2042_v18  ;;  %2100 = vmatpush.msrb.mxu0 %v2073_v42 }
 0x372   : > { %2052 = vmatpush.msra.mxu2 %v2041_v19  ;;  %2101 = vmatpush.msrb.mxu0 %v2072_v47 }
 0x374   : > { %2053 = vmatpush.msra.mxu2 %v2040_v20  ;;  %2102 = vmatpush.msrb.mxu0 %v2071_v48 }
 0x376   : > { %2054 = vmatpush.msra.mxu2 %v2039_v21  ;;  %2103 = vmatpush.msrb.mxu0 %v2070_v49 }
 0x378   : > { %2055 = vmatpush.msra.mxu2 %v2038_v22 }
 0x37a   : > { %2056 = vmatpush.msra.mxu2 %v2037_v23 }
 0x37c   : > { %2057 = vmatpush.msra.mxu2 %v2036_v24 }
 0x37e   : > { %2058 = vmatpush.msra.mxu2 %v2035_v25 }
 0x380   : > { %2059 = vmatpush.msra.mxu2 %v2034_v26 }
 0x382   : > { %2060 = vmatpush.msra.mxu2 %v2033_v27 }
 0x384   : > { %2061 = vmatpush.msra.mxu2 %v2032_v28 }
 0x386   : > { %2062 = vmatpush.msra.mxu2 %v2031_v30 }
 0x388   : > { %2063 = vmatpush.msra.mxu2 %v2030_v31 }
 0x38a   : > { %2064 = vmatpush.msra.mxu2 %v2029_v32 }
 0x3cd   : > { %v1804_v52 = vpop.f32.mrf.mxu0 }
 0x3f0   : > { %v1824_v54 = vpop.f32.mrf.mxu2 }
 0x3f1   : > { %v1825_v55 = vadd.f32 %v1824_v54, %v1804_v52 }
 0x3f3   : > { %v1849_v56 = vrot.slane %v1825_v55, 1  ;;  %v1906_v38 = vrot.slane %v1825_v55, 2  ;;  %2473 = vmatmul.msk.f32.vlgmr.msrb.gmra.mxu3 %vm1850_vm11, %v1825_v55  ;;  %v2081_v55 = vld [vmem:[%s4037_s18] sm:$0x1] }
 0x3f5   : > { %2484 = vmatmul.msk.f32.vlgmr.msrb.gmra.mxu2 %vm1850_vm11, %v1906_v38  ;;  %2472 = vmatmul.msk.f32.vlgmr.msrb.gmra.mxu1 %vm1850_vm11, %v1849_v56 }
 0x472   : > { %v1870_v2 = vpop.f32.mrf.mxu1 }
 0x476   : > { %v1892_v3 = vpop.f32.mrf.mxu3 }
 0x477   : > { %v1893_v5 = vadd.f32 %v1892_v3, %v1870_v2 }
 0x478   : > { %v1926_v7 = vpop.f32.mrf.mxu2 }
 0x479   : > { %v1929_v8 = vadd.f32 %v1926_v7, %v1893_v5 }
 0x47b   : > { %v1934_v9 = vadd.f32 %v2534_v6, %v1929_v8 }
 0x47d   : > { %v1935_v10 = vmax.f32 %v1934_v9, 0.0 }
 0x47f   : > { %2485 = vmatpush.msk.msra.mxu1 %vm1941_vm12, %v1935_v10 }
 0x480   : > { %2486 = vmatmul.msk.f32.vlgmr.msra.gmra.mxu1 %vm1937_vm13, %v1936_v11 }
 0x481   : > { %2020 = vmatpush.msrb.mxu1 %v2003_v4 }
 0x483   : > { %2021 = vmatpush.msrb.mxu1 %v2002_v13 }
 0x485   : > { %2022 = vmatpush.msrb.mxu1 %v2001_v14 }
 0x487   : > { %2023 = vmatpush.msrb.mxu1 %v2000_v16 }
 0x4fd   : > { %v1962_v15 = vpop.f32.mrf.mxu1 }
 0x4fe   : > { %2487 = vmatmul.msk.f32.vlgmr.msra.gmra.mxu3 %vm665_vm1, %v1962_v15 }
 0x581   : > { %v1997_v29 = vpop.f32.mrf.mxu3 }
 0x582   : > { %2488 = vmatmul.msk.f32.vlgmr.msrb.gmra.mxu1 %vm1783_vm10, %v1997_v29 }
 0x5ff   : > { %v2025_v44 = vpop.f32.mrf.mxu1 }
 0x600   : > { %v2026_v45 = vadd.f32 %v2025_v44, %v2004_v43 }
 0x602   : > { %v2028_v46 = vmax.f32 %v2026_v45, 0.0 }
 0x604   : > { %2489 = vmatmul.msk.f32.vlgmr.msra.gmra.mxu2 %vm2045_vm14, %v2028_v46 }
 0x687   : > { %v2066_v51 = vpop.f32.mrf.mxu2 }
 0x688   : > { %v2067_v52 = vadd.f32 %v2066_v51, %v2044_v50 }
 0x68a   : > { %v2069_v54 = vmax.f32 %v2067_v52, 0.0 }
 0x68c   : > { %2491 = vmatmul.msk.f32.vlgmr.msrb.gmra.mxu0 %vm1326_vm7, %v2069_v54 }
 0x709   : > { %v2105_v56 = vpop.f32.mrf.mxu0 }
 0x70a   : > { %v2106_v38 = vadd.f32 %v2105_v56, %v2081_v55 }
 0x70c   : > { %v2109_v39 = vsel %vm2108_vm15, %v2106_v38, -inf }
 0x70d   : > { %2110 = vmax.xlane.f32.xlu0 %v2109_v39 }
 0x780   : > { %v2111_v57 = vpop.xlane.xlu0 %2110 }
 0x781   : > { %v2112_v58 = vsub.f32 %v2106_v38, %v2111_v57 }
 0x783   : > { %v2113_v59 = vmul.f32 1.442695, %v2112_v58 }
 0x785   : > { %2535 = vpow2.f32 %v2113_v59 }
 0x78b   : > { %v2536_v60 = vpop.eup %2535 }
 0x78c   : > { %v2115_v61 = vsel %vm2108_vm15, %v2536_v60, 0.0 }
 0x78d   : > { %2116 = vadd.xlane.f32.xlu0 %v2115_v61 }
 0x800   : > { %v2117_v62 = vpop.xlane.xlu0 %2116 }
 0x801   : > { %2537 = vrcp.f32 %v2117_v62 }
 0x807   : > { %v2538_v63 = vpop.eup %2537 }
 0x808   : > { %v2119_v0 = vmul.f32 %v2538_v63, %v2536_v60 }
 0x80a   : > { %2120 = vst.msk [vmem:[%s594_s28] sm:$0x1] %vm2108_vm15, %v2119_v0 }
 0x80b   : > { %2566 = shalt.err (!%p2563_p3)
}
 0x80c   : > { %2495 = dma.vmem_to_hbm [thread:$0]  (%p2741_p5), %s2133_s20, 16, %s2135_s22, %s2122_s19  }
 0x80d PF: > { %s4077_s21 = sld [smem:[#allocation7_spill]] }
 0x80e   : > { %s4078_s28 = sld [smem:[#allocation5_spill]] }
 0x813   : > { %p2501_p4 = scmp.ge.s32.totalorder %s4077_s21, 2 }
 0x814   : > { %s2146_s6 = sand.u32 1, %s4078_s28  }
 0x815   : > { %p2498_p7 = pnand %p2501_p4, %p2745_p6  ;;  %s2147_s4 = scalar_lea.sflag [#allocation3], %s2146_s6 }
 0x817   : > { %p2499_p8 = pneg %p2498_p7 }
 0x819   : > { %2584 = dma.done.wait (%p2499_p8), %s2147_s4, 16  }
 0x81a   : > { %2586 = vsyncadd (%p2499_p8), %s2147_s4, 4294967280  ;;  %s4080_s21 = sld [smem:[#allocation8_spill]]  ;;  %s4083_s0 = smov %s2593_s30 }
 0x81b   : > { %s4081_s23 = sld [smem:[#allocation6_spill]] }
 0x81c   : > { %s4082_s20 = sld [smem:[#allocation9_spill]] }
 0x820   : > { %p29_p9 = scmp.ge.s32.totalorder %s4080_s21, 4  }
 0x821   : > { %s4084_s30 = smov %s4081_s23 }
 0x822   :  { %31 = sbr.rel (!%p29_p9) target bundleno = 12 (0xc), region = 141 }
 0x827   :  { %2152 = vsyncpa [#allocation3], 1 }
 0x828   :  { %2154 = vsyncpa [#allocation3 + $0x1], 1 }

</bundles_post_ra>
